<compile_context>
chip_gen: v7x
topology: tpu7x:2x2x1
jax: 0.10.0
libtpu: 0.0.40
codegen_flags: <defaults>
</compile_context>

<pallas_src>
import math
from functools import partial

import jax
import jax.numpy as jnp
from jax import lax
from jax.experimental import pallas as pl
from jax.experimental.pallas import tpu as pltpu


def news_encoder_kernel(x_ref,     # (Bblk, L, E) word embeddings for a batch block
                        cw_ref,    # (W, E, F)   conv weight (transposed from (F,E,W))
                        cb_ref,    # (1, F)      conv bias
                        wqkv_ref,  # (F, 3F)     MHA in_proj weight (transposed)
                        bqkv_ref,  # (1, 3F)     MHA in_proj bias
                        wo_ref,    # (F, F)      MHA out_proj weight (transposed)
                        bo_ref,    # (1, F)      MHA out_proj bias
                        aw_ref,    # (F, Q)      additive-attn linear weight (transposed)
                        ab_ref,    # (1, Q)      additive-attn linear bias
                        aq_ref,    # (Q, 1)      additive-attn query vector
                        o_ref,     # (Bblk, F)   output news vectors
                        attn_sc,   # (Bblk, L, F) VMEM scratch for per-head outputs
                        *, num_heads):
    Bblk, L, E = x_ref.shape
    W = cw_ref.shape[0]
    F = cb_ref.shape[1]
    M = Bblk * L
    hd = F // num_heads
    scale = 1.0 / math.sqrt(hd)

    # Flatten the batch block into the matmul M dimension (layout-free reshape).
    X = x_ref[...].reshape(M, E)                                    # (M, E)

    # Position of each flattened row within its sample (for conv boundary masks).
    pos = lax.broadcasted_iota(jnp.int32, (Bblk, L, 1), 1).reshape(M, 1)

    def shift_rows(s):
        # Y[r] = X[r + s] within the same sample, 0 where the conv window falls
        # on the (virtual) zero padding.  Uses concat (unambiguous semantics);
        # pltpu.roll would also work here.
        if s == 0:
            return X
        z = jnp.zeros((abs(s), E), jnp.float32)
        if s > 0:
            y = jnp.concatenate([X[s:, :], z], axis=0)
            keep = (pos <= (L - 1 - s)).astype(jnp.float32)
        else:
            y = jnp.concatenate([z, X[:M + s, :]], axis=0)
            keep = (pos >= -s).astype(jnp.float32)
        return y * keep

    # ---- Conv1d(padding=1) as W shifted matmuls over the whole block + ReLU ----
    conv = jnp.zeros((M, F), jnp.float32)
    for k in range(W):                                              # static unroll, W == 3
        conv = conv + jnp.dot(shift_rows(k - 1), cw_ref[k],
                              preferred_element_type=jnp.float32)
    h = jnp.maximum(conv + cb_ref[0], 0.0)                          # (M, F)

    # ---- Multi-head self-attention ----
    qkv = jnp.dot(h, wqkv_ref[...], preferred_element_type=jnp.float32) + bqkv_ref[0]
    q3 = qkv[:, 0:F].reshape(Bblk, L, F)
    k3 = qkv[:, F:2 * F].reshape(Bblk, L, F)
    v3 = qkv[:, 2 * F:3 * F].reshape(Bblk, L, F)

    for hh in range(num_heads):                                     # static unroll over heads
        lo = hh * hd
        qh = q3[:, :, lo:lo + hd]
        kh = k3[:, :, lo:lo + hd]
        vh = v3[:, :, lo:lo + hd]
        s = jnp.einsum('bld,bmd->blm', qh, kh,
                       preferred_element_type=jnp.float32) * scale   # (Bblk, L, L)
        s = s - jnp.max(s, axis=-1, keepdims=True)
        p = jnp.exp(s)
        p = p * pl.reciprocal(jnp.sum(p, axis=-1, keepdims=True), approx=True)
        oh = jnp.einsum('blm,bmd->bld', p, vh,
                        preferred_element_type=jnp.float32)          # (Bblk, L, hd)
        attn_sc[:, :, lo:lo + hd] = oh                               # in-place head write

    attn = (jnp.dot(attn_sc[...].reshape(M, F), wo_ref[...],
                    preferred_element_type=jnp.float32) + bo_ref[0])  # (M, F)

    # ---- Additive attention over the sequence (per sample) ----
    t = jnp.tanh(jnp.dot(attn, aw_ref[...],
                         preferred_element_type=jnp.float32) + ab_ref[0])   # (M, Q)
    sc = jnp.dot(t, aq_ref[...], preferred_element_type=jnp.float32)        # (M, 1)
    sc3 = sc.reshape(Bblk, L, 1)
    sc3 = sc3 - jnp.max(sc3, axis=1, keepdims=True)
    wgt = jnp.exp(sc3)
    wgt = wgt * pl.reciprocal(jnp.sum(wgt, axis=1, keepdims=True), approx=True)
    o_ref[...] = jnp.sum(wgt * attn.reshape(Bblk, L, F), axis=1)            # (Bblk, F)


def news_encoder_forward(text, params, *, num_heads, block_b=128):
    """text: (B, L) int32 token ids -> (B, F) news vectors."""
    emb = params["embedding"]                       # (V, E)
    x = jnp.take(emb, text, axis=0).astype(jnp.float32)   # (B, L, E) embedding lookup (glue)
    B, L, E = x.shape

    cw, cb = params["conv_w"], params["conv_b"]     # (W,E,F), (1,F)
    wqkv, bqkv = params["mha_in_w"], params["mha_in_b"]
    wo, bo = params["mha_out_w"], params["mha_out_b"]
    aw, ab, aq = params["add_w"], params["add_b"], params["add_q"]
    F = cb.shape[-1]
    assert cw.shape[0] == 3, "kernel assumes window_size == 3 (Conv1d padding=1)"
    assert F % num_heads == 0

    # Batch-block tiling: many samples per grid step; pad B up to a multiple.
    Bblk = min(block_b, B)
    Bp = Bblk * pl.cdiv(B, Bblk)
    if Bp != B:
        x = jnp.pad(x, ((0, Bp - B), (0, 0), (0, 0)))   # padded rows are discarded below

    def full_spec(a):
        nd = a.ndim
        return pl.BlockSpec(a.shape, lambda g, _nd=nd: (0,) * _nd)

    out = pl.pallas_call(
        partial(news_encoder_kernel, num_heads=num_heads),
        out_shape=jax.ShapeDtypeStruct((Bp, F), jnp.float32),
        grid_spec=pltpu.PrefetchScalarGridSpec(
            num_scalar_prefetch=0,
            grid=(Bp // Bblk,),
            in_specs=[
                pl.BlockSpec((Bblk, L, E), lambda g: (g, 0, 0)),
                full_spec(cw), full_spec(cb),
                full_spec(wqkv), full_spec(bqkv),
                full_spec(wo), full_spec(bo),
                full_spec(aw), full_spec(ab), full_spec(aq),
            ],
            out_specs=pl.BlockSpec((Bblk, F), lambda g: (g, 0)),
            scratch_shapes=[pltpu.VMEM((Bblk, L, F), jnp.float32)],
        ),
        compiler_params=pltpu.CompilerParams(
            dimension_semantics=("parallel",),   # batch blocks are independent (v7x megacore)
        ),
    )(x, cw, cb, wqkv, bqkv, wo, bo, aw, ab, aq)
    return out[:B]


def init_params(key, vocab, E, F, W, Q):
    ks = jax.random.split(key, 10)
    s = 0.1
    emb = jax.random.normal(ks[0], (vocab, E), jnp.float32) * s
    emb = emb.at[0].set(0.0)                                  # padding_idx row
    conv_w_torch = jax.random.normal(ks[1], (F, E, W), jnp.float32) * s   # PyTorch (out,in,k)
    params = {
        "embedding": emb,
        "conv_w": jnp.transpose(conv_w_torch, (2, 1, 0)),     # (W, E, F)
        "conv_b": (jax.random.normal(ks[2], (F,), jnp.float32) * s)[None, :],
        "mha_in_w": (jax.random.normal(ks[3], (3 * F, F), jnp.float32) * s).T,  # (F, 3F)
        "mha_in_b": (jax.random.normal(ks[4], (3 * F,), jnp.float32) * s)[None, :],
        "mha_out_w": (jax.random.normal(ks[5], (F, F), jnp.float32) * s).T,
        "mha_out_b": (jax.random.normal(ks[6], (F,), jnp.float32) * s)[None, :],
        "add_w": (jax.random.normal(ks[7], (Q, F), jnp.float32) * s).T,   # (F, Q)
        "add_b": (jax.random.normal(ks[8], (Q,), jnp.float32) * s)[None, :],
        "add_q": (jax.random.normal(ks[9], (Q,), jnp.float32) * s)[:, None],   # (Q, 1)
    }
    return params


def reference_forward(text, P, *, num_heads):
    """Pure-JAX reference (same math, exact division) for validation."""
    def one(tok):
        x = jnp.take(P["embedding"], tok, axis=0)
        xp = jnp.pad(x, ((1, 1), (0, 0)))
        Wk = P["conv_w"]; F = P["conv_b"].shape[-1]
        L = xp.shape[0] - Wk.shape[0] + 1
        conv = sum(xp[k:k + L, :] @ Wk[k] for k in range(Wk.shape[0])) + P["conv_b"][0]
        h = jnp.maximum(conv, 0.0)
        qkv = h @ P["mha_in_w"] + P["mha_in_b"][0]
        q, kk, v = qkv[:, :F], qkv[:, F:2 * F], qkv[:, 2 * F:]
        hd = F // num_heads
        outs = []
        for hh in range(num_heads):
            sl = slice(hh * hd, (hh + 1) * hd)
            s = (q[:, sl] @ kk[:, sl].T) / math.sqrt(hd)
            outs.append(jax.nn.softmax(s, axis=-1) @ v[:, sl])
        attn = jnp.concatenate(outs, axis=-1) @ P["mha_out_w"] + P["mha_out_b"][0]
        t = jnp.tanh(attn @ P["add_w"] + P["add_b"][0])
        w = jax.nn.softmax((t @ P["add_q"])[:, 0], axis=0)
        return jnp.sum(w[:, None] * attn, axis=0)
    return jax.vmap(one)(text)


if __name__ == "__main__":
    B, L = 2, 16
    VOCAB, E, F, W, H, Q = 50, 32, 32, 3, 4, 16

    key = jax.random.PRNGKey(0)
    k_params, k_text = jax.random.split(key)
    params = init_params(k_params, VOCAB, E, F, W, Q)
    text = jax.random.randint(k_text, (B, L), 0, VOCAB, dtype=jnp.int32)

    out = news_encoder_forward(text, params, num_heads=H)
    out = jax.block_until_ready(out)

    ref = reference_forward(text, params, num_heads=H)
    assert out.shape == (B, F)
    # Tolerance relaxed vs. 1e-4 because the softmax denominators use the
    # approximate EUP reciprocal (pl.reciprocal(..., approx=True)).
    assert jnp.allclose(out, ref, atol=5e-3, rtol=5e-3), "mismatch vs reference"

    print("KERNEL_OK")
</pallas_src>

<mosaic_0001>
module attributes {stable_mosaic.version = 11 : i64} {
  func.func @news_encoder_kernel(%arg0: i32, %arg1: memref<2x16x32xf32, #tpu.memory_space<vmem>>, %arg2: memref<3x32x32xf32, #tpu.memory_space<vmem>>, %arg3: memref<1x32xf32, #tpu.memory_space<vmem>>, %arg4: memref<32x96xf32, #tpu.memory_space<vmem>>, %arg5: memref<1x96xf32, #tpu.memory_space<vmem>>, %arg6: memref<32x32xf32, #tpu.memory_space<vmem>>, %arg7: memref<1x32xf32, #tpu.memory_space<vmem>>, %arg8: memref<32x16xf32, #tpu.memory_space<vmem>>, %arg9: memref<1x16xf32, #tpu.memory_space<vmem>>, %arg10: memref<16x1xf32, #tpu.memory_space<vmem>>, %arg11: memref<2x32xf32, #tpu.memory_space<vmem>>, %arg12: memref<2x16x32xf32, #tpu.memory_space<vmem>>) attributes {dimension_semantics = [#tpu.dimension_semantics<parallel>], iteration_bounds = array<i64: 1>, scalar_prefetch = 0 : i64, scratch_operands = 1 : i64, tpu.core_type = #tpu.core_type<tc>, window_params = [{transform_indices = @transform_0, window_bounds = array<i64: 2, 16, 32>}, {pipeline_mode = #tpu.pipeline_mode<synchronous>, transform_indices = @transform_1, window_bounds = array<i64: 3, 32, 32>}, {pipeline_mode = #tpu.pipeline_mode<synchronous>, transform_indices = @transform_2, window_bounds = array<i64: 1, 32>}, {pipeline_mode = #tpu.pipeline_mode<synchronous>, transform_indices = @transform_3, window_bounds = array<i64: 32, 96>}, {pipeline_mode = #tpu.pipeline_mode<synchronous>, transform_indices = @transform_4, window_bounds = array<i64: 1, 96>}, {pipeline_mode = #tpu.pipeline_mode<synchronous>, transform_indices = @transform_5, window_bounds = array<i64: 32, 32>}, {pipeline_mode = #tpu.pipeline_mode<synchronous>, transform_indices = @transform_6, window_bounds = array<i64: 1, 32>}, {pipeline_mode = #tpu.pipeline_mode<synchronous>, transform_indices = @transform_7, window_bounds = array<i64: 32, 16>}, {pipeline_mode = #tpu.pipeline_mode<synchronous>, transform_indices = @transform_8, window_bounds = array<i64: 1, 16>}, {pipeline_mode = #tpu.pipeline_mode<synchronous>, transform_indices = @transform_9, window_bounds = array<i64: 16, 1>}, {transform_indices = @transform_10, window_bounds = array<i64: 2, 32>}]} {
    %c0 = arith.constant 0 : index
    %c0_0 = arith.constant 0 : index
    %c0_1 = arith.constant 0 : index
    %0 = vector.load %arg1[%c0, %c0_0, %c0_1] : memref<2x16x32xf32, #tpu.memory_space<vmem>>, vector<2x16x32xf32>
    %1 = vector.shape_cast %0 : vector<2x16x32xf32> to vector<32x32xf32>
    %2 = tpu.iota {dimensions = array<i32: 1>} : vector<2x16x1xi32>
    %3 = vector.shape_cast %2 : vector<2x16x1xi32> to vector<32x1xi32>
    %cst = arith.constant 0.000000e+00 : f32
    %4 = vector.broadcast %cst : f32 to vector<32x32xf32>
    %cst_2 = arith.constant 0.000000e+00 : f32
    %5 = vector.broadcast %cst_2 : f32 to vector<1x32xf32>
    %6 = vector.extract_strided_slice %1 {offsets = [0, 0], sizes = [31, 32], strides = [1, 1]} : vector<32x32xf32> to vector<31x32xf32>
    %7 = tpu.concatenate %5, %6 in 0 : vector<1x32xf32>, vector<31x32xf32> -> vector<32x32xf32>
    %c1_i32 = arith.constant 1 : i32
    %8 = vector.broadcast %c1_i32 : i32 to vector<32x1xi32>
    %9 = arith.cmpi sge, %3, %8 : vector<32x1xi32>
    %10 = arith.extui %9 : vector<32x1xi1> to vector<32x1xi32>
    %11 = arith.sitofp %10 : vector<32x1xi32> to vector<32x1xf32>
    %12 = vector.broadcast %11 : vector<32x1xf32> to vector<32x32xf32>
    %13 = arith.mulf %7, %12 : vector<32x32xf32>
    %c0_3 = arith.constant 0 : index
    %c0_4 = arith.constant 0 : index
    %c0_5 = arith.constant 0 : index
    %14 = vector.load %arg2[%c0_3, %c0_4, %c0_5] : memref<3x32x32xf32, #tpu.memory_space<vmem>>, vector<1x32x32xf32>
    %15 = vector.shape_cast %14 : vector<1x32x32xf32> to vector<32x32xf32>
    %cst_6 = arith.constant dense<0.000000e+00> : vector<32x32xf32>
    %16 = tpu.matmul %13, %15, %cst_6 {dimension_numbers = #tpu.dot_dimension_numbers<[1], [0], [0], [1], [0, 0, 1, 1], [], []>} : vector<32x32xf32>, vector<32x32xf32>, vector<32x32xf32> -> vector<32x32xf32>
    %17 = arith.addf %4, %16 : vector<32x32xf32>
    %c1 = arith.constant 1 : index
    %c0_7 = arith.constant 0 : index
    %c0_8 = arith.constant 0 : index
    %18 = vector.load %arg2[%c1, %c0_7, %c0_8] : memref<3x32x32xf32, #tpu.memory_space<vmem>>, vector<1x32x32xf32>
    %19 = vector.shape_cast %18 : vector<1x32x32xf32> to vector<32x32xf32>
    %cst_9 = arith.constant dense<0.000000e+00> : vector<32x32xf32>
    %20 = tpu.matmul %1, %19, %cst_9 {dimension_numbers = #tpu.dot_dimension_numbers<[1], [0], [0], [1], [0, 0, 1, 1], [], []>} : vector<32x32xf32>, vector<32x32xf32>, vector<32x32xf32> -> vector<32x32xf32>
    %21 = arith.addf %17, %20 : vector<32x32xf32>
    %cst_10 = arith.constant 0.000000e+00 : f32
    %22 = vector.broadcast %cst_10 : f32 to vector<1x32xf32>
    %23 = vector.extract_strided_slice %1 {offsets = [1, 0], sizes = [31, 32], strides = [1, 1]} : vector<32x32xf32> to vector<31x32xf32>
    %24 = tpu.concatenate %23, %22 in 0 : vector<31x32xf32>, vector<1x32xf32> -> vector<32x32xf32>
    %c14_i32 = arith.constant 14 : i32
    %25 = vector.broadcast %c14_i32 : i32 to vector<32x1xi32>
    %26 = arith.cmpi sle, %3, %25 : vector<32x1xi32>
    %27 = arith.extui %26 : vector<32x1xi1> to vector<32x1xi32>
    %28 = arith.sitofp %27 : vector<32x1xi32> to vector<32x1xf32>
    %29 = vector.broadcast %28 : vector<32x1xf32> to vector<32x32xf32>
    %30 = arith.mulf %24, %29 : vector<32x32xf32>
    %c2 = arith.constant 2 : index
    %c0_11 = arith.constant 0 : index
    %c0_12 = arith.constant 0 : index
    %31 = vector.load %arg2[%c2, %c0_11, %c0_12] : memref<3x32x32xf32, #tpu.memory_space<vmem>>, vector<1x32x32xf32>
    %32 = vector.shape_cast %31 : vector<1x32x32xf32> to vector<32x32xf32>
    %cst_13 = arith.constant dense<0.000000e+00> : vector<32x32xf32>
    %33 = tpu.matmul %30, %32, %cst_13 {dimension_numbers = #tpu.dot_dimension_numbers<[1], [0], [0], [1], [0, 0, 1, 1], [], []>} : vector<32x32xf32>, vector<32x32xf32>, vector<32x32xf32> -> vector<32x32xf32>
    %34 = arith.addf %21, %33 : vector<32x32xf32>
    %c0_14 = arith.constant 0 : index
    %c0_15 = arith.constant 0 : index
    %35 = vector.load %arg3[%c0_14, %c0_15] : memref<1x32xf32, #tpu.memory_space<vmem>>, vector<1x32xf32>
    %36 = vector.shape_cast %35 : vector<1x32xf32> to vector<32xf32>
    %37 = vector.shape_cast %36 : vector<32xf32> to vector<1x32xf32>
    %38 = vector.broadcast %37 : vector<1x32xf32> to vector<32x32xf32>
    %39 = arith.addf %34, %38 : vector<32x32xf32>
    %cst_16 = arith.constant 0.000000e+00 : f32
    %40 = vector.broadcast %cst_16 : f32 to vector<32x32xf32>
    %41 = arith.maximumf %39, %40 : vector<32x32xf32>
    %c0_17 = arith.constant 0 : index
    %c0_18 = arith.constant 0 : index
    %42 = vector.load %arg4[%c0_17, %c0_18] : memref<32x96xf32, #tpu.memory_space<vmem>>, vector<32x96xf32>
    %cst_19 = arith.constant dense<0.000000e+00> : vector<32x96xf32>
    %43 = tpu.matmul %41, %42, %cst_19 {dimension_numbers = #tpu.dot_dimension_numbers<[1], [0], [0], [1], [0, 0, 1, 1], [], []>} : vector<32x32xf32>, vector<32x96xf32>, vector<32x96xf32> -> vector<32x96xf32>
    %c0_20 = arith.constant 0 : index
    %c0_21 = arith.constant 0 : index
    %44 = vector.load %arg5[%c0_20, %c0_21] : memref<1x96xf32, #tpu.memory_space<vmem>>, vector<1x96xf32>
    %45 = vector.shape_cast %44 : vector<1x96xf32> to vector<96xf32>
    %46 = vector.shape_cast %45 : vector<96xf32> to vector<1x96xf32>
    %47 = vector.broadcast %46 : vector<1x96xf32> to vector<32x96xf32>
    %48 = arith.addf %43, %47 : vector<32x96xf32>
    %49 = vector.extract_strided_slice %48 {offsets = [0, 0], sizes = [32, 32], strides = [1, 1]} : vector<32x96xf32> to vector<32x32xf32>
    %50 = vector.shape_cast %49 : vector<32x32xf32> to vector<2x16x32xf32>
    %51 = vector.extract_strided_slice %48 {offsets = [0, 32], sizes = [32, 32], strides = [1, 1]} : vector<32x96xf32> to vector<32x32xf32>
    %52 = vector.shape_cast %51 : vector<32x32xf32> to vector<2x16x32xf32>
    %53 = vector.extract_strided_slice %48 {offsets = [0, 64], sizes = [32, 32], strides = [1, 1]} : vector<32x96xf32> to vector<32x32xf32>
    %54 = vector.shape_cast %53 : vector<32x32xf32> to vector<2x16x32xf32>
    %55 = vector.extract_strided_slice %50 {offsets = [0, 0, 0], sizes = [2, 16, 8], strides = [1, 1, 1]} : vector<2x16x32xf32> to vector<2x16x8xf32>
    %56 = vector.extract_strided_slice %52 {offsets = [0, 0, 0], sizes = [2, 16, 8], strides = [1, 1, 1]} : vector<2x16x32xf32> to vector<2x16x8xf32>
    %57 = vector.extract_strided_slice %54 {offsets = [0, 0, 0], sizes = [2, 16, 8], strides = [1, 1, 1]} : vector<2x16x32xf32> to vector<2x16x8xf32>
    "tpu.trace_start"() <{level = 10 : i32, message = "bld,bmd->blm"}> : () -> ()
    %cst_22 = arith.constant dense<0.000000e+00> : vector<2x16x16xf32>
    %58 = tpu.matmul %55, %56, %cst_22 {dimension_numbers = #tpu.dot_dimension_numbers<[2], [2], [1], [1], [0, 0, 0, 1, 1, 1], [0], [0]>} : vector<2x16x8xf32>, vector<2x16x8xf32>, vector<2x16x16xf32> -> vector<2x16x16xf32>
    "tpu.trace_stop"() : () -> ()
    %cst_23 = arith.constant 0.353553385 : f32
    %59 = vector.broadcast %cst_23 : f32 to vector<2x16x16xf32>
    %60 = arith.mulf %58, %59 : vector<2x16x16xf32>
    %cst_24 = arith.constant dense<0xFF800000> : vector<2x16xf32>
    %61 = vector.multi_reduction <maximumf>, %60, %cst_24 [2] : vector<2x16x16xf32> to vector<2x16xf32>
    %62 = vector.shape_cast %61 : vector<2x16xf32> to vector<2x16x1xf32>
    %63 = vector.broadcast %62 : vector<2x16x1xf32> to vector<2x16x16xf32>
    %64 = arith.subf %60, %63 : vector<2x16x16xf32>
    %65 = math.exp %64 : vector<2x16x16xf32>
    %cst_25 = arith.constant dense<0.000000e+00> : vector<2x16xf32>
    %66 = vector.multi_reduction <add>, %65, %cst_25 [2] : vector<2x16x16xf32> to vector<2x16xf32>
    %67 = vector.shape_cast %66 : vector<2x16xf32> to vector<2x16x1xf32>
    %68 = tpu.reciprocal %67 {approx = true} : vector<2x16x1xf32> -> vector<2x16x1xf32>
    %69 = vector.broadcast %68 : vector<2x16x1xf32> to vector<2x16x16xf32>
    %70 = arith.mulf %65, %69 : vector<2x16x16xf32>
    "tpu.trace_start"() <{level = 10 : i32, message = "blm,bmd->bld"}> : () -> ()
    %cst_26 = arith.constant dense<0.000000e+00> : vector<2x16x8xf32>
    %71 = tpu.matmul %70, %57, %cst_26 {dimension_numbers = #tpu.dot_dimension_numbers<[2], [1], [1], [2], [0, 0, 0, 1, 1, 2], [0], [0]>} : vector<2x16x16xf32>, vector<2x16x8xf32>, vector<2x16x8xf32> -> vector<2x16x8xf32>
    "tpu.trace_stop"() : () -> ()
    %c0_27 = arith.constant 0 : index
    %c0_28 = arith.constant 0 : index
    %c0_29 = arith.constant 0 : index
    %72 = vector.load %arg12[%c0_27, %c0_28, %c0_29] : memref<2x16x32xf32, #tpu.memory_space<vmem>>, vector<2x16x8xf32>
    tpu.vector_store %arg12[%c0_27, %c0_28, %c0_29], %71 {strides = array<i32>} : memref<2x16x32xf32, #tpu.memory_space<vmem>>, vector<2x16x8xf32>,
    %73 = vector.extract_strided_slice %50 {offsets = [0, 0, 8], sizes = [2, 16, 8], strides = [1, 1, 1]} : vector<2x16x32xf32> to vector<2x16x8xf32>
    %74 = vector.extract_strided_slice %52 {offsets = [0, 0, 8], sizes = [2, 16, 8], strides = [1, 1, 1]} : vector<2x16x32xf32> to vector<2x16x8xf32>
    %75 = vector.extract_strided_slice %54 {offsets = [0, 0, 8], sizes = [2, 16, 8], strides = [1, 1, 1]} : vector<2x16x32xf32> to vector<2x16x8xf32>
    "tpu.trace_start"() <{level = 10 : i32, message = "bld,bmd->blm"}> : () -> ()
    %cst_30 = arith.constant dense<0.000000e+00> : vector<2x16x16xf32>
    %76 = tpu.matmul %73, %74, %cst_30 {dimension_numbers = #tpu.dot_dimension_numbers<[2], [2], [1], [1], [0, 0, 0, 1, 1, 1], [0], [0]>} : vector<2x16x8xf32>, vector<2x16x8xf32>, vector<2x16x16xf32> -> vector<2x16x16xf32>
    "tpu.trace_stop"() : () -> ()
    %cst_31 = arith.constant 0.353553385 : f32
    %77 = vector.broadcast %cst_31 : f32 to vector<2x16x16xf32>
    %78 = arith.mulf %76, %77 : vector<2x16x16xf32>
    %cst_32 = arith.constant dense<0xFF800000> : vector<2x16xf32>
    %79 = vector.multi_reduction <maximumf>, %78, %cst_32 [2] : vector<2x16x16xf32> to vector<2x16xf32>
    %80 = vector.shape_cast %79 : vector<2x16xf32> to vector<2x16x1xf32>
    %81 = vector.broadcast %80 : vector<2x16x1xf32> to vector<2x16x16xf32>
    %82 = arith.subf %78, %81 : vector<2x16x16xf32>
    %83 = math.exp %82 : vector<2x16x16xf32>
    %cst_33 = arith.constant dense<0.000000e+00> : vector<2x16xf32>
    %84 = vector.multi_reduction <add>, %83, %cst_33 [2] : vector<2x16x16xf32> to vector<2x16xf32>
    %85 = vector.shape_cast %84 : vector<2x16xf32> to vector<2x16x1xf32>
    %86 = tpu.reciprocal %85 {approx = true} : vector<2x16x1xf32> -> vector<2x16x1xf32>
    %87 = vector.broadcast %86 : vector<2x16x1xf32> to vector<2x16x16xf32>
    %88 = arith.mulf %83, %87 : vector<2x16x16xf32>
    "tpu.trace_start"() <{level = 10 : i32, message = "blm,bmd->bld"}> : () -> ()
    %cst_34 = arith.constant dense<0.000000e+00> : vector<2x16x8xf32>
    %89 = tpu.matmul %88, %75, %cst_34 {dimension_numbers = #tpu.dot_dimension_numbers<[2], [1], [1], [2], [0, 0, 0, 1, 1, 2], [0], [0]>} : vector<2x16x16xf32>, vector<2x16x8xf32>, vector<2x16x8xf32> -> vector<2x16x8xf32>
    "tpu.trace_stop"() : () -> ()
    %c0_35 = arith.constant 0 : index
    %c0_36 = arith.constant 0 : index
    %c8 = arith.constant 8 : index
    %90 = vector.load %arg12[%c0_35, %c0_36, %c8] : memref<2x16x32xf32, #tpu.memory_space<vmem>>, vector<2x16x8xf32>
    tpu.vector_store %arg12[%c0_35, %c0_36, %c8], %89 {strides = array<i32>} : memref<2x16x32xf32, #tpu.memory_space<vmem>>, vector<2x16x8xf32>,
    %91 = vector.extract_strided_slice %50 {offsets = [0, 0, 16], sizes = [2, 16, 8], strides = [1, 1, 1]} : vector<2x16x32xf32> to vector<2x16x8xf32>
    %92 = vector.extract_strided_slice %52 {offsets = [0, 0, 16], sizes = [2, 16, 8], strides = [1, 1, 1]} : vector<2x16x32xf32> to vector<2x16x8xf32>
    %93 = vector.extract_strided_slice %54 {offsets = [0, 0, 16], sizes = [2, 16, 8], strides = [1, 1, 1]} : vector<2x16x32xf32> to vector<2x16x8xf32>
    "tpu.trace_start"() <{level = 10 : i32, message = "bld,bmd->blm"}> : () -> ()
    %cst_37 = arith.constant dense<0.000000e+00> : vector<2x16x16xf32>
    %94 = tpu.matmul %91, %92, %cst_37 {dimension_numbers = #tpu.dot_dimension_numbers<[2], [2], [1], [1], [0, 0, 0, 1, 1, 1], [0], [0]>} : vector<2x16x8xf32>, vector<2x16x8xf32>, vector<2x16x16xf32> -> vector<2x16x16xf32>
    "tpu.trace_stop"() : () -> ()
    %cst_38 = arith.constant 0.353553385 : f32
    %95 = vector.broadcast %cst_38 : f32 to vector<2x16x16xf32>
    %96 = arith.mulf %94, %95 : vector<2x16x16xf32>
    %cst_39 = arith.constant dense<0xFF800000> : vector<2x16xf32>
    %97 = vector.multi_reduction <maximumf>, %96, %cst_39 [2] : vector<2x16x16xf32> to vector<2x16xf32>
    %98 = vector.shape_cast %97 : vector<2x16xf32> to vector<2x16x1xf32>
    %99 = vector.broadcast %98 : vector<2x16x1xf32> to vector<2x16x16xf32>
    %100 = arith.subf %96, %99 : vector<2x16x16xf32>
    %101 = math.exp %100 : vector<2x16x16xf32>
    %cst_40 = arith.constant dense<0.000000e+00> : vector<2x16xf32>
    %102 = vector.multi_reduction <add>, %101, %cst_40 [2] : vector<2x16x16xf32> to vector<2x16xf32>
    %103 = vector.shape_cast %102 : vector<2x16xf32> to vector<2x16x1xf32>
    %104 = tpu.reciprocal %103 {approx = true} : vector<2x16x1xf32> -> vector<2x16x1xf32>
    %105 = vector.broadcast %104 : vector<2x16x1xf32> to vector<2x16x16xf32>
    %106 = arith.mulf %101, %105 : vector<2x16x16xf32>
    "tpu.trace_start"() <{level = 10 : i32, message = "blm,bmd->bld"}> : () -> ()
    %cst_41 = arith.constant dense<0.000000e+00> : vector<2x16x8xf32>
    %107 = tpu.matmul %106, %93, %cst_41 {dimension_numbers = #tpu.dot_dimension_numbers<[2], [1], [1], [2], [0, 0, 0, 1, 1, 2], [0], [0]>} : vector<2x16x16xf32>, vector<2x16x8xf32>, vector<2x16x8xf32> -> vector<2x16x8xf32>
    "tpu.trace_stop"() : () -> ()
    %c0_42 = arith.constant 0 : index
    %c0_43 = arith.constant 0 : index
    %c16 = arith.constant 16 : index
    %108 = vector.load %arg12[%c0_42, %c0_43, %c16] : memref<2x16x32xf32, #tpu.memory_space<vmem>>, vector<2x16x8xf32>
    tpu.vector_store %arg12[%c0_42, %c0_43, %c16], %107 {strides = array<i32>} : memref<2x16x32xf32, #tpu.memory_space<vmem>>, vector<2x16x8xf32>,
    %109 = vector.extract_strided_slice %50 {offsets = [0, 0, 24], sizes = [2, 16, 8], strides = [1, 1, 1]} : vector<2x16x32xf32> to vector<2x16x8xf32>
    %110 = vector.extract_strided_slice %52 {offsets = [0, 0, 24], sizes = [2, 16, 8], strides = [1, 1, 1]} : vector<2x16x32xf32> to vector<2x16x8xf32>
    %111 = vector.extract_strided_slice %54 {offsets = [0, 0, 24], sizes = [2, 16, 8], strides = [1, 1, 1]} : vector<2x16x32xf32> to vector<2x16x8xf32>
    "tpu.trace_start"() <{level = 10 : i32, message = "bld,bmd->blm"}> : () -> ()
    %cst_44 = arith.constant dense<0.000000e+00> : vector<2x16x16xf32>
    %112 = tpu.matmul %109, %110, %cst_44 {dimension_numbers = #tpu.dot_dimension_numbers<[2], [2], [1], [1], [0, 0, 0, 1, 1, 1], [0], [0]>} : vector<2x16x8xf32>, vector<2x16x8xf32>, vector<2x16x16xf32> -> vector<2x16x16xf32>
    "tpu.trace_stop"() : () -> ()
    %cst_45 = arith.constant 0.353553385 : f32
    %113 = vector.broadcast %cst_45 : f32 to vector<2x16x16xf32>
    %114 = arith.mulf %112, %113 : vector<2x16x16xf32>
    %cst_46 = arith.constant dense<0xFF800000> : vector<2x16xf32>
    %115 = vector.multi_reduction <maximumf>, %114, %cst_46 [2] : vector<2x16x16xf32> to vector<2x16xf32>
    %116 = vector.shape_cast %115 : vector<2x16xf32> to vector<2x16x1xf32>
    %117 = vector.broadcast %116 : vector<2x16x1xf32> to vector<2x16x16xf32>
    %118 = arith.subf %114, %117 : vector<2x16x16xf32>
    %119 = math.exp %118 : vector<2x16x16xf32>
    %cst_47 = arith.constant dense<0.000000e+00> : vector<2x16xf32>
    %120 = vector.multi_reduction <add>, %119, %cst_47 [2] : vector<2x16x16xf32> to vector<2x16xf32>
    %121 = vector.shape_cast %120 : vector<2x16xf32> to vector<2x16x1xf32>
    %122 = tpu.reciprocal %121 {approx = true} : vector<2x16x1xf32> -> vector<2x16x1xf32>
    %123 = vector.broadcast %122 : vector<2x16x1xf32> to vector<2x16x16xf32>
    %124 = arith.mulf %119, %123 : vector<2x16x16xf32>
    "tpu.trace_start"() <{level = 10 : i32, message = "blm,bmd->bld"}> : () -> ()
    %cst_48 = arith.constant dense<0.000000e+00> : vector<2x16x8xf32>
    %125 = tpu.matmul %124, %111, %cst_48 {dimension_numbers = #tpu.dot_dimension_numbers<[2], [1], [1], [2], [0, 0, 0, 1, 1, 2], [0], [0]>} : vector<2x16x16xf32>, vector<2x16x8xf32>, vector<2x16x8xf32> -> vector<2x16x8xf32>
    "tpu.trace_stop"() : () -> ()
    %c0_49 = arith.constant 0 : index
    %c0_50 = arith.constant 0 : index
    %c24 = arith.constant 24 : index
    %126 = vector.load %arg12[%c0_49, %c0_50, %c24] : memref<2x16x32xf32, #tpu.memory_space<vmem>>, vector<2x16x8xf32>
    tpu.vector_store %arg12[%c0_49, %c0_50, %c24], %125 {strides = array<i32>} : memref<2x16x32xf32, #tpu.memory_space<vmem>>, vector<2x16x8xf32>,
    %c0_51 = arith.constant 0 : index
    %c0_52 = arith.constant 0 : index
    %c0_53 = arith.constant 0 : index
    %127 = vector.load %arg12[%c0_51, %c0_52, %c0_53] : memref<2x16x32xf32, #tpu.memory_space<vmem>>, vector<2x16x32xf32>
    %128 = vector.shape_cast %127 : vector<2x16x32xf32> to vector<32x32xf32>
    %c0_54 = arith.constant 0 : index
    %c0_55 = arith.constant 0 : index
    %129 = vector.load %arg6[%c0_54, %c0_55] : memref<32x32xf32, #tpu.memory_space<vmem>>, vector<32x32xf32>
    %cst_56 = arith.constant dense<0.000000e+00> : vector<32x32xf32>
    %130 = tpu.matmul %128, %129, %cst_56 {dimension_numbers = #tpu.dot_dimension_numbers<[1], [0], [0], [1], [0, 0, 1, 1], [], []>} : vector<32x32xf32>, vector<32x32xf32>, vector<32x32xf32> -> vector<32x32xf32>
    %c0_57 = arith.constant 0 : index
    %c0_58 = arith.constant 0 : index
    %131 = vector.load %arg7[%c0_57, %c0_58] : memref<1x32xf32, #tpu.memory_space<vmem>>, vector<1x32xf32>
    %132 = vector.shape_cast %131 : vector<1x32xf32> to vector<32xf32>
    %133 = vector.shape_cast %132 : vector<32xf32> to vector<1x32xf32>
    %134 = vector.broadcast %133 : vector<1x32xf32> to vector<32x32xf32>
    %135 = arith.addf %130, %134 : vector<32x32xf32>
    %c0_59 = arith.constant 0 : index
    %c0_60 = arith.constant 0 : index
    %136 = vector.load %arg8[%c0_59, %c0_60] : memref<32x16xf32, #tpu.memory_space<vmem>>, vector<32x16xf32>
    %cst_61 = arith.constant dense<0.000000e+00> : vector<32x16xf32>
    %137 = tpu.matmul %135, %136, %cst_61 {dimension_numbers = #tpu.dot_dimension_numbers<[1], [0], [0], [1], [0, 0, 1, 1], [], []>} : vector<32x32xf32>, vector<32x16xf32>, vector<32x16xf32> -> vector<32x16xf32>
    %c0_62 = arith.constant 0 : index
    %c0_63 = arith.constant 0 : index
    %138 = vector.load %arg9[%c0_62, %c0_63] : memref<1x16xf32, #tpu.memory_space<vmem>>, vector<1x16xf32>
    %139 = vector.shape_cast %138 : vector<1x16xf32> to vector<16xf32>
    %140 = vector.shape_cast %139 : vector<16xf32> to vector<1x16xf32>
    %141 = vector.broadcast %140 : vector<1x16xf32> to vector<32x16xf32>
    %142 = arith.addf %137, %141 : vector<32x16xf32>
    %143 = math.tanh %142 : vector<32x16xf32>
    %c0_64 = arith.constant 0 : index
    %c0_65 = arith.constant 0 : index
    %144 = vector.load %arg10[%c0_64, %c0_65] : memref<16x1xf32, #tpu.memory_space<vmem>>, vector<16x1xf32>
    %cst_66 = arith.constant dense<0.000000e+00> : vector<32x1xf32>
    %145 = tpu.matmul %143, %144, %cst_66 {dimension_numbers = #tpu.dot_dimension_numbers<[1], [0], [0], [1], [0, 0, 1, 1], [], []>} : vector<32x16xf32>, vector<16x1xf32>, vector<32x1xf32> -> vector<32x1xf32>
    %146 = vector.shape_cast %145 : vector<32x1xf32> to vector<2x16x1xf32>
    %cst_67 = arith.constant dense<0xFF800000> : vector<2x1xf32>
    %147 = vector.multi_reduction <maximumf>, %146, %cst_67 [1] : vector<2x16x1xf32> to vector<2x1xf32>
    %148 = vector.shape_cast %147 : vector<2x1xf32> to vector<2x1x1xf32>
    %149 = vector.broadcast %148 : vector<2x1x1xf32> to vector<2x16x1xf32>
    %150 = arith.subf %146, %149 : vector<2x16x1xf32>
    %151 = math.exp %150 : vector<2x16x1xf32>
    %cst_68 = arith.constant dense<0.000000e+00> : vector<2x1xf32>
    %152 = vector.multi_reduction <add>, %151, %cst_68 [1] : vector<2x16x1xf32> to vector<2x1xf32>
    %153 = vector.shape_cast %152 : vector<2x1xf32> to vector<2x1x1xf32>
    %154 = tpu.reciprocal %153 {approx = true} : vector<2x1x1xf32> -> vector<2x1x1xf32>
    %155 = vector.broadcast %154 : vector<2x1x1xf32> to vector<2x16x1xf32>
    %156 = arith.mulf %151, %155 : vector<2x16x1xf32>
    %157 = vector.shape_cast %135 : vector<32x32xf32> to vector<2x16x32xf32>
    %158 = vector.broadcast %156 : vector<2x16x1xf32> to vector<2x16x32xf32>
    %159 = arith.mulf %158, %157 : vector<2x16x32xf32>
    %cst_69 = arith.constant dense<0.000000e+00> : vector<2x32xf32>
    %160 = vector.multi_reduction <add>, %159, %cst_69 [1] : vector<2x16x32xf32> to vector<2x32xf32>
    %c0_70 = arith.constant 0 : index
    %c0_71 = arith.constant 0 : index
    %161 = vector.load %arg11[%c0_70, %c0_71] : memref<2x32xf32, #tpu.memory_space<vmem>>, vector<2x32xf32>
    tpu.vector_store %arg11[%c0_70, %c0_71], %160 {strides = array<i32>} : memref<2x32xf32, #tpu.memory_space<vmem>>, vector<2x32xf32>,
    return
  }
  func.func @transform_0(%arg0: i32) -> (i32, i32, i32) {
    %c0_i32 = arith.constant 0 : i32
    %c0_i32_0 = arith.constant 0 : i32
    %c0_i32_1 = arith.constant 0 : i32
    return %arg0, %c0_i32, %c0_i32_0 : i32, i32, i32
  }
  func.func @transform_1(%arg0: i32) -> (i32, i32, i32) {
    %c0_i32 = arith.constant 0 : i32
    %c0_i32_0 = arith.constant 0 : i32
    %c0_i32_1 = arith.constant 0 : i32
    %c0_i32_2 = arith.constant 0 : i32
    return %c0_i32, %c0_i32_0, %c0_i32_1 : i32, i32, i32
  }
  func.func @transform_2(%arg0: i32) -> (i32, i32) {
    %c0_i32 = arith.constant 0 : i32
    %c0_i32_0 = arith.constant 0 : i32
    %c0_i32_1 = arith.constant 0 : i32
    return %c0_i32, %c0_i32_0 : i32, i32
  }
  func.func @transform_3(%arg0: i32) -> (i32, i32) {
    %c0_i32 = arith.constant 0 : i32
    %c0_i32_0 = arith.constant 0 : i32
    %c0_i32_1 = arith.constant 0 : i32
    return %c0_i32, %c0_i32_0 : i32, i32
  }
  func.func @transform_4(%arg0: i32) -> (i32, i32) {
    %c0_i32 = arith.constant 0 : i32
    %c0_i32_0 = arith.constant 0 : i32
    %c0_i32_1 = arith.constant 0 : i32
    return %c0_i32, %c0_i32_0 : i32, i32
  }
  func.func @transform_5(%arg0: i32) -> (i32, i32) {
    %c0_i32 = arith.constant 0 : i32
    %c0_i32_0 = arith.constant 0 : i32
    %c0_i32_1 = arith.constant 0 : i32
    return %c0_i32, %c0_i32_0 : i32, i32
  }
  func.func @transform_6(%arg0: i32) -> (i32, i32) {
    %c0_i32 = arith.constant 0 : i32
    %c0_i32_0 = arith.constant 0 : i32
    %c0_i32_1 = arith.constant 0 : i32
    return %c0_i32, %c0_i32_0 : i32, i32
  }
  func.func @transform_7(%arg0: i32) -> (i32, i32) {
    %c0_i32 = arith.constant 0 : i32
    %c0_i32_0 = arith.constant 0 : i32
    %c0_i32_1 = arith.constant 0 : i32
    return %c0_i32, %c0_i32_0 : i32, i32
  }
  func.func @transform_8(%arg0: i32) -> (i32, i32) {
    %c0_i32 = arith.constant 0 : i32
    %c0_i32_0 = arith.constant 0 : i32
    %c0_i32_1 = arith.constant 0 : i32
    return %c0_i32, %c0_i32_0 : i32, i32
  }
  func.func @transform_9(%arg0: i32) -> (i32, i32) {
    %c0_i32 = arith.constant 0 : i32
    %c0_i32_0 = arith.constant 0 : i32
    %c0_i32_1 = arith.constant 0 : i32
    return %c0_i32, %c0_i32_0 : i32, i32
  }
  func.func @transform_10(%arg0: i32) -> (i32, i32) {
    %c0_i32 = arith.constant 0 : i32
    %c0_i32_0 = arith.constant 0 : i32
    return %arg0, %c0_i32 : i32, i32
  }
}

</mosaic_0001>

<bundles_post_ra>
// kernel: tpu_custom_call.1
= control target key start
LH: loop header
LB: loop body
LE: loop exit
PB: predicated region body
PF: predicated region fallthrough
CT: control target
= control target key end

     0   :  { %15 = vsyncpa [#allocation4], 0  ;;  %s4002_s0 = inlined_call_operand.vmem [shape: f32[2,16,32], index: 0, kind: input, shape index: {}]   ;;  %s4003_s1 = inlined_call_operand.hbm [shape: f32[3,32,32], index: 1, kind: input, shape index: {}]   ;;  %s4004_s2 = inlined_call_operand.hbm [shape: f32[1,32], index: 2, kind: input, shape index: {}]   ;;  %s4005_s3 = inlined_call_operand.vmem [shape: f32[32,96], index: 3, kind: input, shape index: {}]   ;;  %s4006_s4 = inlined_call_operand.hbm [shape: f32[1,96], index: 4, kind: input, shape index: {}]   ;;  %s4007_s5 = inlined_call_operand.hbm [shape: f32[32,32], index: 5, kind: input, shape index: {}]   ;;  %s4008_s6 = inlined_call_operand.vmem [shape: f32[1,32], index: 6, kind: input, shape index: {}]   ;;  %s4009_s7 = inlined_call_operand.vmem [shape: f32[32,16], index: 7, kind: input, shape index: {}]   ;;  %s4010_s8 = inlined_call_operand.vmem [shape: f32[1,16], index: 8, kind: input, shape index: {}]   ;;  %s4011_s9 = inlined_call_operand.vmem [shape: f32[16,1], index: 9, kind: input, shape index: {}]   ;;  %s4012_s10 = inlined_call_operand.hbm [shape: f32[2,32], index: 10, kind: output, shape index: {}]  }
   0x1   :  { %16 = vsyncpa [#allocation7], 0 }
   0x2   :  { %17 = vsyncpa [#allocation10], 0 }
   0x3   :  { %18 = vsyncpa [#allocation5], 0  ;;  %s3550_s13 = smov [#allocation6]   ;;  %s3551_s15 = smov [#allocation3]  }
   0x4   :  { %s39_s14 = sshll.u32 %s3550_s13, 4  ;;  %s26_s16 = sshll.u32 %s3551_s15, 4  ;;  %s40_s14 = int_to_ptr.vmem [resolvable:$true] %s39_s14  ;;  %s3627_s16 = int_to_ptr.vmem [resolvable:$true] %s26_s16 }
   0x5   :  { %s3432_s19 = scalar_lea.hbm %s4004_s2, 16 }
   0x6   :  { %p3433_p0 = scmp.ne.s32.totalorder %s4004_s2, %s3432_s19  ;;  %p3436_p1 = scmp.lt.u32.totalorder %s3432_s19, %s4004_s2 }
   0x8   :  { %p3438_p2 = pnand %p3436_p1, %p3433_p0 }
   0xa   :  { %3441 = shalt.err (!%p3438_p2)
}
   0xb   :  { %s3442_s24 = scalar_lea.vmem %s40_s14, 16  ;;  %s3446_s25 = scalar_lea.vmem %s40_s14, 32 }
   0xc   :  { %p3443_p3 = scmp.ne.s32.totalorder %s40_s14, %s3442_s24  ;;  %p3447_p4 = scmp.lt.s32.totalorder %s40_s14, %s40_s14 }
   0xd   :  { %p3448_p5 = scmp.lt.s32.totalorder %s3446_s25, %s3442_s24 }
   0xf   :  { %p3449_p6 = por %p3448_p5, %p3447_p4 }
  0x11   :  { %p3450_p7 = pnand %p3449_p6, %p3443_p3 }
  0x13   :  { %3453 = shalt.err (!%p3450_p7)
}
  0x14   :  { %42 = dma.hbm_to_vmem [thread:$0]  %s4004_s2, 16, %s40_s14, [#allocation7]  }
  0x15   :  { %s3454_s30 = scalar_lea.hbm %s4003_s1, 1536 }
  0x16   :  { %p3455_p8 = scmp.ne.s32.totalorder %s4003_s1, %s3454_s30  ;;  %p3458_p9 = scmp.lt.u32.totalorder %s3454_s30, %s4003_s1 }
  0x18   :  { %p3460_p10 = pnand %p3458_p9, %p3455_p8 }
  0x1a   :  { %3463 = shalt.err (!%p3460_p10)
}
  0x1b   :  { %s3464_s17 = scalar_lea.vmem %s3627_s16, 1536  ;;  %p3469_p12 = scmp.lt.s32.totalorder %s3627_s16, %s3627_s16 }
  0x1c   :  { %p3465_p11 = scmp.ne.s32.totalorder %s3627_s16, %s3464_s17  ;;  %p3470_p13 = scmp.lt.s32.totalorder %s3464_s17, %s3464_s17 }
  0x1e   :  { %p3471_p0 = por %p3470_p13, %p3469_p12 }
  0x20   :  { %p3472_p1 = pnand %p3471_p0, %p3465_p11 }
  0x22   :  { %3475 = shalt.err (!%p3472_p1)
}
  0x23   :  { %s3552_s2 = smov 128   ;;  %s3553_s14 = smov 8  }
  0x24   :  { %32 = dma.hbm_to_vmem [thread:$0]  %s4003_s1, 1536, %s3627_s16, [#allocation4], %s3552_s2, %s3552_s2, %s3553_s14  }
  0x25   :  { %s3554_s20 = smov [#allocation8]   ;;  %s3555_s22 = smov [#allocation9]  }
  0x26   :  { %s51_s21 = sshll.u32 %s3554_s20, 4  ;;  %s60_s23 = sshll.u32 %s3555_s22, 4  ;;  %s52_s21 = int_to_ptr.vmem [resolvable:$true] %s51_s21  ;;  %s3661_s23 = int_to_ptr.vmem [resolvable:$true] %s60_s23 }
  0x27   :  { %s3476_s26 = scalar_lea.hbm %s4006_s4, 16 }
  0x28   :  { %p3477_p2 = scmp.ne.s32.totalorder %s4006_s4, %s3476_s26  ;;  %p3480_p3 = scmp.lt.u32.totalorder %s3476_s26, %s4006_s4 }
  0x2a   :  { %p3482_p4 = pnand %p3480_p3, %p3477_p2 }
  0x2c   :  { %3485 = shalt.err (!%p3482_p4)
}
  0x2d   :  { %s3486_s1 = scalar_lea.vmem %s52_s21, 16  ;;  %s3490_s16 = scalar_lea.vmem %s52_s21, 32 }
  0x2e   :  { %p3487_p5 = scmp.ne.s32.totalorder %s52_s21, %s3486_s1  ;;  %p3491_p6 = scmp.lt.s32.totalorder %s52_s21, %s52_s21 }
  0x2f   :  { %p3492_p7 = scmp.lt.s32.totalorder %s3490_s16, %s3486_s1 }
  0x31   :  { %p3493_p8 = por %p3492_p7, %p3491_p6 }
  0x33   :  { %p3494_p9 = pnand %p3493_p8, %p3487_p5 }
  0x35   :  { %3497 = shalt.err (!%p3494_p9)
}
  0x36   :  { %54 = dma.hbm_to_vmem [thread:$0]  %s4006_s4, 16, %s52_s21, [#allocation7]  }
  0x37   :  { %s3498_s17 = scalar_lea.hbm %s4007_s5, 512 }
  0x38   :  { %p3499_p10 = scmp.ne.s32.totalorder %s4007_s5, %s3498_s17  ;;  %p3502_p11 = scmp.lt.u32.totalorder %s3498_s17, %s4007_s5 }
  0x3a   :  { %p3504_p12 = pnand %p3502_p11, %p3499_p10 }
  0x3c   :  { %3507 = shalt.err (!%p3504_p12)
}
  0x3d   :  { %s3508_s24 = scalar_lea.vmem %s3661_s23, 512  ;;  %p3513_p0 = scmp.lt.s32.totalorder %s3661_s23, %s3661_s23 }
  0x3e   :  { %p3509_p13 = scmp.ne.s32.totalorder %s3661_s23, %s3508_s24  ;;  %p3514_p1 = scmp.lt.s32.totalorder %s3508_s24, %s3508_s24 }
  0x40   :  { %p3515_p2 = por %p3514_p1, %p3513_p0 }
  0x42   :  { %p3516_p3 = pnand %p3515_p2, %p3509_p13 }
  0x44   :  { %3519 = shalt.err (!%p3516_p3)
}
  0x45   :  { %66 = dma.hbm_to_vmem [thread:$0]  %s4007_s5, 512, %s3661_s23, [#allocation10], %s3552_s2, %s3552_s2, %s3553_s14  }
  0x46   :  { %3542 = dma.done.wait [#allocation4], 1536  }
  0x47   :  { %3543 = vsyncadd [#allocation4], 4294965760 }
  0x48   :  { %3544 = dma.done.wait [#allocation7], 32  }
  0x49   :  { %3545 = vsyncadd [#allocation7], 4294967264 }
  0x4a   :  { %3546 = dma.done.wait [#allocation10], 512  }
  0x4b   :  { %3547 = vsyncadd [#allocation10], 4294966784  ;;  %v91_v0 = vlaneseq  ;;  %vm130_vm0 = vcmask 261120   ;;  %v126_v1 = vld [vmem:[#allocation3 + $0x20] sm:$0xff]  ;;  %v127_v2 = vld [vmem:[#allocation3 + $0x28] sm:$0xff]  ;;  %vm98_vm2 = vcmask 1040384  }
  0x4c   :  { %v128_v3 = vld [vmem:[#allocation3 + $0x30] sm:$0xff]  ;;  %v3104_v4 = vpack.c.bf16 %v127_v2, %v126_v1  ;;  %v129_v5 = vld [vmem:[#allocation3 + $0x38] sm:$0xff]  ;;  %v3698_v6 = vld [vmem:[%s4002_s0] sm:$0xff]  ;;  %v3556_v18 = vmov 0.0   ;;  %vm321_vm4 = vcmask 1046528   ;;  %vm579_vm5 = vcmask 64512  }
  0x4d   :  { %v92_v7 = vshrl.u32 %v91_v0, 7  ;;  %v3108_v8 = vpack.c.bf16 %v129_v5, %v128_v3  ;;  %2906 = vmatprep.mubr.msk.f32.mxu0 %vm130_vm0, %v3698_v6  ;;  %v121_v9 = vld [vmem:[#allocation3] sm:$0xff]  ;;  %v122_v10 = vld [vmem:[#allocation3 + $0x8] sm:$0xff]  ;;  %v99_v11 = vrot.slane %v3698_v6, 7  ;;  %v123_v15 = vld [vmem:[#allocation3 + $0x10] sm:$0xff]  ;;  %v322_v40 = vrot.slane %v3698_v6, 1 }
  0x4e   :  { %3105 = vmatprep.subr.bf16.mxu0 %v3104_v4  ;;  %v3112_v12 = vpack.c.bf16 %v122_v10, %v121_v9  ;;  %v465_v13 = vld [vmem:[%s4005_s3] sm:$0xff]  ;;  %v466_v14 = vld [vmem:[%s4005_s3 + $0x8] sm:$0xff]  ;;  %v124_v16 = vld [vmem:[#allocation3 + $0x18] sm:$0xff]  ;;  %vm756_vm7 = vcmask 130048   ;;  %s3558_s17 = smov 64   ;;  %s3559_s18 = smov 88  }
  0x4f   :  { %3107 = vmatpush3.bf16.msra.mxu0 %v3104_v4  ;;  %vm111_vm1 = vcmp.ge.s32.totalorder %v92_v7, 1  ;;  %v3128_v17 = vpack.c.bf16 %v466_v14, %v465_v13  ;;  %v88_v20 = vld [vmem:[%s4002_s0 + $0x8] sm:$0xff]  ;;  %v89_v21 = vld [vmem:[%s4002_s0 + $0x10] sm:$0xff]  ;;  %v110_v22 = vsel %vm98_vm2, 0.0, %v99_v11  ;;  %v3116_v25 = vpack.c.bf16 %v124_v16, %v123_v15  ;;  %v345_v26 = vld [vmem:[#allocation3 + $0x40] sm:$0xff]  ;;  %s3560_s19 = smov 120  }
  0x50   :  { %3109 = vmatprep.subr.bf16.mxu0 %v3108_v8  ;;  %v2698_v19 = vsel %vm111_vm1, 1.0, %v3556_v18  ;;  %v100_v23 = vrot.slane %v88_v20, 7  ;;  %v102_v24 = vrot.slane %v89_v21, 7  ;;  %v346_v27 = vld [vmem:[#allocation3 + $0x48] sm:$0xff]  ;;  %v90_v29 = vld [vmem:[%s4002_s0 + $0x18] sm:$0xff]  ;;  %v93_v30 = vadd.s32 8, %v92_v7  ;;  %vm3766_vm6 = vmpackc.low %vm579_vm5, %vm579_vm5 }
  0x51   :  { %3129 = vmatprep.subr.bf16.mxu1 %v3128_v17  ;;  %v117_v28 = vmul.f32 %v2698_v19, %v110_v22  ;;  %v3120_v31 = vpack.c.bf16 %v346_v27, %v345_v26  ;;  %v347_v33 = vld [vmem:[#allocation3 + $0x50] sm:$0xff]  ;;  %v348_v34 = vld [vmem:[#allocation3 + $0x58] sm:$0xff]  ;;  %v323_v35 = vrot.slane %v88_v20, 1  ;;  %v325_v36 = vrot.slane %v89_v21, 1  ;;  %v2712_v54 = vld [vmem:[#allocation6] ss:$0 sm:$0xff] }
  0x52   :  { %3131 = vmatpush3.bf16.msra.mxu1 %v3128_v17  ;;  %v103_v32 = vsel %vm98_vm2, %v100_v23, %v102_v24  ;;  %v104_v37 = vrot.slane %v90_v29, 7  ;;  %v101_v38 = vsel %vm98_vm2, %v99_v11, %v100_v23  ;;  %vm335_vm3 = vcmp.le.s32.totalorder %v93_v30, 14  ;;  %v467_v51 = vld [vmem:[%s4005_s3 + $0x10] sm:$0xff]  ;;  %v468_v52 = vld [vmem:[%s4005_s3 + $0x18] sm:$0xff]  ;;  %v2713_v3 = vld [vmem:[#allocation8] ss:$0 sm:$0xff] }
  0x53   :  { %3111 = vmatpush3.bf16.msra.mxu0 %v3108_v8  ;;  %v119_v39 = vmul.f32 %v2698_v19, %v103_v32  ;;  %v3124_v41 = vpack.c.bf16 %v348_v34, %v347_v33  ;;  %v2707_v42 = vsel %vm335_vm3, 1.0, %v3556_v18  ;;  %v327_v43 = vrot.slane %v90_v29, 1  ;;  %s3557_s3 = smov 96   ;;  %s3561_s20 = smov 56  }
  0x54   :  { %3113 = vmatprep.subr.bf16.mxu0 %v3112_v12  ;;  %v105_v44 = vsel %vm98_vm2, %v102_v24, %v104_v37  ;;  %v326_v45 = vsel %vm321_vm4, %v323_v35, %v325_v36  ;;  %v324_v46 = vsel %vm321_vm4, %v322_v40, %v323_v35  ;;  %v3132_v53 = vpack.c.bf16 %v468_v52, %v467_v51  ;;  %s3562_s22 = smov 80   ;;  %s3563_s24 = smov 112  }
  0x55   :  { %v341_v47 = vmul.f32 %v2707_v42, %v326_v45  ;;  %v333_v48 = vsel %vm321_vm4, %v327_v43, 0.0  ;;  %v328_v49 = vsel %vm321_vm4, %v325_v36, %v327_v43  ;;  %s3564_s4 = smov 48   ;;  %s3565_s21 = smov 72   ;;  %vm1399_vm8 = vcmask 130112  }
  0x56   :  { %2907 = vmatmul.mubr.msk.f32.vlgmr.msra.gmra.mrb[0].mxu0 %vm130_vm0, %v88_v20  ;;  %v343_v50 = vmul.f32 %v2707_v42, %v333_v48  ;;  %3133 = vmatprep.subr.bf16.mxu1 %v3132_v53  ;;  %s3566_s25 = smov 104   ;;  %s3567_s26 = smov 40   ;;  %vm1824_vm9 = vcmask 195712   ;;  %vm2249_vm10 = vcmask 261312   ;;  %vm2577_vm11 = vcmask 7168  }
  0x57   :  { %3115 = vmatpush3.bf16.msra.mxu0 %v3112_v12  ;;  %2909 = vmatprep.mubr.msk.f32.mxu0 %vm130_vm0, %v89_v21  ;;  %s3568_s5 = smov 16   ;;  %vm2676_vm12 = vcmask 1041409   ;;  %vm2679_vm13 = vcmask 254976  }
  0x58   :  { %3117 = vmatprep.subr.bf16.mxu0 %v3116_v25  ;;  %3135 = vmatpush3.bf16.msra.mxu1 %v3132_v53 }
  0x5a   :  { %2910 = vmatmul.mubr.msk.f32.gmra.mrb[2].mxu0 %vm130_vm0, %v90_v29 }
  0x5b   :  { %3119 = vmatpush3.bf16.msra.mxu0 %v3116_v25  ;;  %2920 = vmatprep.mubr.msk.f32.mxu0 %vm130_vm0, %v117_v28 }
  0x5c   :  { %3121 = vmatprep.subr.bf16.mxu0 %v3120_v31 }
  0x5e   :  { %2921 = vmatmul.mubr.msk.f32.vlgmr.msra.gmra.mrb[0].mxu0 %vm130_vm0, %v101_v38 }
  0x5f   :  { %3123 = vmatpush3.bf16.msra.mxu0 %v3120_v31  ;;  %2923 = vmatprep.mubr.msk.f32.mxu0 %vm130_vm0, %v119_v39 }
  0x60   :  { %3125 = vmatprep.subr.bf16.mxu0 %v3124_v41 }
  0x62   :  { %2924 = vmatmul.mubr.msk.f32.gmra.mrb[2].mxu0 %vm130_vm0, %v105_v44 }
  0x63   :  { %3127 = vmatpush3.bf16.msra.mxu0 %v3124_v41  ;;  %2934 = vmatprep.mubr.msk.f32.mxu0 %vm130_vm0, %v324_v46 }
  0x66   :  { %2935 = vmatmul.mubr.msk.f32.vlgmr.msra.gmra.mrb[0].mxu0 %vm130_vm0, %v341_v47 }
  0x67   :  { %2937 = vmatprep.mubr.msk.f32.mxu0 %vm130_vm0, %v328_v49 }
  0x6a   :  { %2938 = vmatmul.mubr.msk.f32.gmra.mrb[2].mxu0 %vm130_vm0, %v343_v50 }
 0x139   :  { %v2936_v55 = vpop.f32.mrb[0].mxu0 }
 0x13a   :  { %v458_v56 = vadd.f32 %v2936_v55, %v2712_v54  ;;  %v427_v57 = vpop.f32.mrb[1].mxu0 }
 0x13b   :  { %v457_v58 = vadd.f32 %v2712_v54, %v427_v57 }
 0x13c   :  { %v462_v61 = vmax.f32 %v458_v56, 0.0 }
 0x13d   :  { %v461_v59 = vmax.f32 %v457_v58, 0.0  ;;  %v2939_v60 = vpop.f32.mrb[2].mxu0 }
 0x13e   :  { %v460_v62 = vadd.f32 %v2939_v60, %v2712_v54  ;;  %v437_v63 = vpop.f32.mrb[3].mxu0 }
 0x13f   :  { %v459_v0 = vadd.f32 %v2712_v54, %v437_v63  ;;  %2948 = vmatprep.mubr.msk.f32.mxu1 %vm130_vm0, %v461_v59 }
 0x140   :  { %2949 = vmatmul.mubr.msk.f32.vlgmr.msra.gmra.mrb[0].mxu1 %vm130_vm0, %v462_v61  ;;  %v464_v2 = vmax.f32 %v460_v62, 0.0 }
 0x141   :  { %v463_v1 = vmax.f32 %v459_v0, 0.0 }
 0x143   :  { %2951 = vmatprep.mubr.msk.f32.mxu1 %vm130_vm0, %v463_v1 }
 0x144   :  { %2952 = vmatmul.mubr.msk.f32.gmra.mrb[2].mxu1 %vm130_vm0, %v464_v2 }
 0x213   :  { %v2950_v4 = vpop.f32.mrb[0].mxu1 }
 0x214   :  { %v3744_v5 = vadd.f32 %v2950_v4, %v2713_v3  ;;  %v554_v6 = vpop.f32.mrb[1].mxu1 }
 0x215   :  { %v3746_v7 = vadd.f32 %v2713_v3, %v554_v6 }
 0x217   :  { %v2953_v8 = vpop.f32.mrb[2].mxu1  ;;  %2958 = vmatprep.mubr.msk.f32.mxu1 %vm579_vm5, %v3746_v7  ;;  %v3752_v9 = vpack.i.bf16 %v3744_v5, %v3746_v7 }
 0x218   :  { %v3754_v10 = vadd.f32 %v2953_v8, %v2713_v3  ;;  %v564_v11 = vpop.f32.mrb[3].mxu1 }
 0x219   :  { %v3756_v12 = vadd.f32 %v2713_v3, %v564_v11  ;;  %3267 = vrot.lane.b32.xlu0 %v3752_v9, %s3557_s3 }
 0x21b   :  { %v3761_v13 = vpack.i.bf16 %v3754_v10, %v3756_v12 }
 0x21d   :  { %3272 = vrot.lane.b32.xlu0 %v3761_v13, %s3557_s3 }
 0x28b   :  { %v3268_v14 = vpop.permute.xlu0 %3267 }
 0x28c   :  { %v3270_v15 = vunpack.i.h.bf16 %v3268_v14  ;;  %v3269_v16 = vunpack.i.l.bf16 %v3268_v14 }
 0x28e   :  { %v3136_v18 = vpack.c.bf16 %v3270_v15, %v3269_v16 }
 0x28f   :  { %v3273_v19 = vpop.permute.xlu0 %3272 }
 0x290   :  { %v3275_v20 = vunpack.i.h.bf16 %v3273_v19  ;;  %v3274_v21 = vunpack.i.l.bf16 %v3273_v19  ;;  %3138 = vmatprep.subr.msk.bf16.mxu1 %vm3766_vm6, %v3136_v18 }
 0x291   :  { %3141 = vmatpush3.bf16.xpose.msk.msra.mxu1 %vm3766_vm6, %v3136_v18 }
 0x292   :  { %v3142_v22 = vpack.c.bf16 %v3275_v20, %v3274_v21 }
 0x294   :  { %3144 = vmatprep.subr.msk.bf16.mxu1 %vm3766_vm6, %v3142_v22 }
 0x298   :  { %2959 = vmatmul.mubr.msk.f32.vlgmr.msra.gmra.mrb[4].mxu1 %vm579_vm5, %v3744_v5 }
 0x299   :  { %3147 = vmatpush3.bf16.xpose.msk.msra.mxu1 %vm3766_vm6, %v3142_v22  ;;  %2965 = vmatprep.mubr.msk.f32.mxu1 %vm579_vm5, %v3756_v12 }
 0x2a0   :  { %2966 = vmatmul.mubr.msk.f32.vlgmr.msra.gmra.mrb[6].mxu1 %vm579_vm5, %v3754_v10 }
 0x36b   :  { %v2960_v23 = vpop.f32.mrb[4].mxu1 }
 0x36c   :  { %v654_v24 = vpop.f32.mrb[5].mxu1  ;;  %v753_v26 = vmul.f32 0.35355338, %v2960_v23 }
 0x36d   :  { %v752_v25 = vmul.f32 0.35355338, %v654_v24 }
 0x36e   :  { %v760_v29 = vsel %vm756_vm7, %v753_v26, -inf }
 0x36f   :  { %v757_v27 = vsel %vm756_vm7, %v752_v25, -inf }
 0x370   :  { %758 = vmax.xlane.f32.xlu1 %v757_v27 }
 0x373   :  { %v2967_v28 = vpop.f32.mrb[6].mxu1 }
 0x374   :  { %v755_v30 = vmul.f32 0.35355338, %v2967_v28  ;;  %761 = vmax.xlane.f32.xlu1 %v760_v29  ;;  %v743_v31 = vpop.f32.mrb[7].mxu1 }
 0x375   :  { %v754_v32 = vmul.f32 0.35355338, %v743_v31 }
 0x376   :  { %v766_v33 = vsel %vm756_vm7, %v755_v30, -inf }
 0x377   :  { %v763_v34 = vsel %vm756_vm7, %v754_v32, -inf }
 0x378   :  { %767 = vmax.xlane.f32.xlu1 %v766_v33  ;;  %764 = vmax.xlane.f32.xlu0 %v763_v34 }
 0x389   :  { %3277 = vrot.lane.b32.xlu1 %v3752_v9, %s3558_s17 }
 0x38d   :  { %3287 = vrot.lane.b32.xlu1 %v3752_v9, %s3559_s18 }
 0x38e   :  { %3282 = vrot.lane.b32.xlu0 %v3761_v13, %s3558_s17 }
 0x391   :  { %3292 = vrot.lane.b32.xlu1 %v3761_v13, %s3559_s18 }
 0x392   :  { %1070 = vrot.lane.b32.xlu0 %v3756_v12, %s3560_s19 }
 0x395   :  { %979 = vrot.lane.b32.xlu1 %v3746_v7, %s3560_s19 }
 0x399   :  { %981 = vrot.lane.b32.xlu1 %v3744_v5, %s3560_s19 }
 0x3fd   :  { %v759_v35 = vpop.xlane.xlu1 %758 }
 0x3fe   :  { %v769_v36 = vsub.f32 %v752_v25, %v759_v35 }
 0x400   :  { %v773_v39 = vmul.f32 1.442695, %v769_v36 }
 0x401   :  { %v762_v37 = vpop.xlane.xlu1 %761 }
 0x402   :  { %v770_v38 = vsub.f32 %v753_v26, %v762_v37 }
 0x404   :  { %v775_v40 = vmul.f32 1.442695, %v770_v38 }
 0x405   :  { %v768_v41 = vpop.xlane.xlu1 %767  ;;  %v765_v42 = vpop.xlane.xlu0 %764 }
 0x406   :  { %3348 = vpow2.f32 %v775_v40  ;;  %v772_v43 = vsub.f32 %v755_v30, %v768_v41  ;;  %v771_v45 = vsub.f32 %v754_v32, %v765_v42 }
 0x407   :  { %3350 = vpow2.f32 %v773_v39 }
 0x408   :  { %v779_v44 = vmul.f32 1.442695, %v772_v43  ;;  %v777_v52 = vmul.f32 1.442695, %v771_v45 }
 0x409   :  { %v3278_v46 = vpop.permute.xlu1 %3277  ;;  %v3283_v47 = vpop.permute.xlu0 %3282 }
 0x40a   :  { %v3280_v48 = vunpack.i.h.bf16 %v3278_v46  ;;  %v3279_v49 = vunpack.i.l.bf16 %v3278_v46  ;;  %v3285_v50 = vunpack.i.h.bf16 %v3283_v47  ;;  %v3284_v51 = vunpack.i.l.bf16 %v3283_v47 }
 0x40b   :  { %3352 = vpow2.f32 %v779_v44 }
 0x40c   :  { %v3148_v53 = vpack.c.bf16 %v3280_v48, %v3279_v49  ;;  %v3152_v54 = vpack.c.bf16 %v3285_v50, %v3284_v51  ;;  %3354 = vpow2.f32 %v777_v52 }
 0x40d   :  { %v3288_v55 = vpop.permute.xlu1 %3287  ;;  %v1071_v28 = vpop.permute.xlu0 %1070 }
 0x40e   :  { %v3290_v56 = vunpack.i.h.bf16 %v3288_v55  ;;  %v3289_v57 = vunpack.i.l.bf16 %v3288_v55  ;;  %3149 = vmatprep.subr.bf16.mxu1 %v3148_v53  ;;  %3153 = vmatprep.subr.bf16.mxu0 %v3152_v54 }
 0x40f   :  { %3151 = vmatpush3.bf16.msra.mxu1 %v3148_v53  ;;  %3155 = vmatpush3.bf16.msra.mxu0 %v3152_v54 }
 0x410   :  { %v3349_v58 = vpop.eup %3348  ;;  %v3156_v59 = vpack.c.bf16 %v3290_v56, %v3289_v57 }
 0x411   :  { %v3293_v60 = vpop.permute.xlu1 %3292  ;;  %v784_v61 = vsel %vm756_vm7, %v3349_v58, 0.0  ;;  %v3351_v62 = vpop.eup %3350 }
 0x412   :  { %v3295_v63 = vunpack.i.h.bf16 %v3293_v60  ;;  %v3294_v0 = vunpack.i.l.bf16 %v3293_v60  ;;  %785 = vadd.xlane.f32.xlu1 %v784_v61  ;;  %3158 = vmatprep.subr.msk.bf16.mxu1 %vm3766_vm6, %v3156_v59  ;;  %v781_v2 = vsel %vm756_vm7, %v3351_v62, 0.0 }
 0x414   :  { %v3162_v1 = vpack.c.bf16 %v3295_v63, %v3294_v0 }
 0x415   :  { %v3353_v3 = vpop.eup %3352  ;;  %v980_v11 = vpop.permute.xlu1 %979 }
 0x416   :  { %782 = vadd.xlane.f32.xlu1 %v781_v2  ;;  %3164 = vmatprep.subr.msk.bf16.mxu0 %vm3766_vm6, %v3162_v1  ;;  %v790_v4 = vsel %vm756_vm7, %v3353_v3, 0.0  ;;  %v3355_v6 = vpop.eup %3354 }
 0x417   :  { %v787_v8 = vsel %vm756_vm7, %v3355_v6, 0.0 }
 0x419   :  { %v982_v14 = vpop.permute.xlu1 %981 }
 0x41a   :  { %791 = vadd.xlane.f32.xlu1 %v790_v4 }
 0x41e   :  { %788 = vadd.xlane.f32.xlu1 %v787_v8 }
 0x42f   :  { %1072 = vrot.lane.b32.xlu1 %v3754_v10, %s3560_s19 }
 0x49f   :  { %v786_v15 = vpop.xlane.xlu1 %785 }
 0x4a0   :  { %3356 = vrcp.f32 %v786_v15 }
 0x4a3   :  { %v783_v16 = vpop.xlane.xlu1 %782 }
 0x4a4   :  { %3358 = vrcp.f32 %v783_v16 }
 0x4a7   :  { %v792_v18 = vpop.xlane.xlu1 %791 }
 0x4a8   :  { %3360 = vrcp.f32 %v792_v18 }
 0x4aa   :  { %v3357_v20 = vpop.eup %3356 }
 0x4ab   :  { %v789_v19 = vpop.xlane.xlu1 %788  ;;  %v798_v23 = vmul.f32 %v3357_v20, %v3349_v58 }
 0x4ac   :  { %3362 = vrcp.f32 %v789_v19 }
 0x4ae   :  { %v3359_v21 = vpop.eup %3358 }
 0x4af   :  { %v797_v22 = vmul.f32 %v3359_v21, %v3351_v62  ;;  %v1073_v29 = vpop.permute.xlu1 %1072 }
 0x4b1   :  { %2972 = vmatprep.mubr.msk.f32.mxu1 %vm756_vm7, %v797_v22 }
 0x4b2   :  { %2973 = vmatmul.mubr.msk.f32.vlgmr.msra.gmra.mrb[8].mxu1 %vm756_vm7, %v798_v23  ;;  %v3361_v24 = vpop.eup %3360 }
 0x4b3   :  { %3161 = vmatpush3.bf16.xpose.msk.msra.mxu1 %vm3766_vm6, %v3156_v59  ;;  %2986 = vmatprep.mubr.msk.f32.mxu1 %vm579_vm5, %v980_v11  ;;  %v800_v27 = vmul.f32 %v3361_v24, %v3353_v3 }
 0x4b6   :  { %v3363_v25 = vpop.eup %3362 }
 0x4b7   :  { %v799_v26 = vmul.f32 %v3363_v25, %v3355_v6 }
 0x4b9   :  { %2979 = vmatprep.mubr.msk.f32.mxu0 %vm756_vm7, %v799_v26 }
 0x4ba   :  { %2987 = vmatmul.mubr.msk.f32.vlgmr.msra.gmra.mrb[10].mxu1 %vm579_vm5, %v982_v14  ;;  %2980 = vmatmul.mubr.msk.f32.vlgmr.msra.gmra.mrb[4].mxu0 %vm756_vm7, %v800_v27 }
 0x4bb   :  { %3167 = vmatpush3.bf16.xpose.msk.msra.mxu0 %vm3766_vm6, %v3162_v1  ;;  %2993 = vmatprep.mubr.msk.f32.mxu0 %vm579_vm5, %v1071_v28 }
 0x4c2   :  { %2994 = vmatmul.mubr.msk.f32.vlgmr.msra.gmra.mrb[6].mxu0 %vm579_vm5, %v1073_v29 }
 0x585   :  { %v2974_v30 = vpop.f32.mrb[8].mxu1 }
 0x586   :  { %976 = vst.msk [vmem:[#allocation2 + $0x8] sm:$0xff] %vm579_vm5, %v2974_v30  ;;  %v879_v31 = vpop.f32.mrb[9].mxu1 }
 0x587   :  { %975 = vst.msk [vmem:[#allocation2] sm:$0xff] %vm579_vm5, %v879_v31 }
 0x58d   :  { %v2988_v32 = vpop.f32.mrb[10].mxu1  ;;  %v2981_v33 = vpop.f32.mrb[4].mxu0 }
 0x58e   :  { %v1162_v34 = vmul.f32 0.35355338, %v2988_v32  ;;  %978 = vst.msk [vmem:[#allocation2 + $0x18] sm:$0xff] %vm579_vm5, %v2981_v33  ;;  %v1061_v35 = vpop.f32.mrb[11].mxu1  ;;  %v966_v36 = vpop.f32.mrb[5].mxu0 }
 0x58f   :  { %v1161_v37 = vmul.f32 0.35355338, %v1061_v35  ;;  %977 = vst.msk [vmem:[#allocation2 + $0x10] sm:$0xff] %vm579_vm5, %v966_v36 }
 0x590   :  { %v1168_v38 = vsel %vm756_vm7, %v1162_v34, -inf }
 0x591   :  { %1169 = vmax.xlane.f32.xlu1 %v1168_v38  ;;  %v1165_v39 = vsel %vm756_vm7, %v1161_v37, -inf }
 0x592   :  { %1166 = vmax.xlane.f32.xlu0 %v1165_v39 }
 0x595   :  { %v2995_v40 = vpop.f32.mrb[6].mxu0 }
 0x596   :  { %v1152_v41 = vpop.f32.mrb[7].mxu0  ;;  %v1164_v43 = vmul.f32 0.35355338, %v2995_v40 }
 0x597   :  { %v1163_v42 = vmul.f32 0.35355338, %v1152_v41 }
 0x598   :  { %v1174_v45 = vsel %vm756_vm7, %v1164_v43, -inf }
 0x599   :  { %v1171_v44 = vsel %vm756_vm7, %v1163_v42, -inf }
 0x59a   :  { %1172 = vmax.xlane.f32.xlu0 %v1171_v44 }
 0x59e   :  { %1175 = vmax.xlane.f32.xlu0 %v1174_v45 }
 0x5a2   :  { %3297 = vrot.lane.b32.xlu1 %v3752_v9, %s3561_s20 }
 0x5a6   :  { %3307 = vrot.lane.b32.xlu1 %v3752_v9, %s3562_s22 }
 0x5aa   :  { %3312 = vrot.lane.b32.xlu1 %v3761_v13, %s3562_s22 }
 0x5b4   :  { %3302 = vrot.lane.b32.xlu0 %v3761_v13, %s3561_s20 }
 0x61e   :  { %v1170_v46 = vpop.xlane.xlu1 %1169 }
 0x61f   :  { %v1178_v47 = vsub.f32 %v1162_v34, %v1170_v46  ;;  %v1167_v48 = vpop.xlane.xlu0 %1166 }
 0x620   :  { %v1177_v49 = vsub.f32 %v1161_v37, %v1167_v48 }
 0x621   :  { %v1183_v50 = vmul.f32 1.442695, %v1178_v47 }
 0x622   :  { %v1181_v51 = vmul.f32 1.442695, %v1177_v49  ;;  %v3298_v52 = vpop.permute.xlu1 %3297 }
 0x623   :  { %3364 = vpow2.f32 %v1183_v50  ;;  %v3300_v53 = vunpack.i.h.bf16 %v3298_v52  ;;  %v3299_v54 = vunpack.i.l.bf16 %v3298_v52 }
 0x624   :  { %3366 = vpow2.f32 %v1181_v51 }
 0x625   :  { %v3168_v55 = vpack.c.bf16 %v3300_v53, %v3299_v54 }
 0x626   :  { %v3308_v56 = vpop.permute.xlu1 %3307 }
 0x627   :  { %v3310_v57 = vunpack.i.h.bf16 %v3308_v56  ;;  %v3309_v58 = vunpack.i.l.bf16 %v3308_v56  ;;  %3169 = vmatprep.subr.bf16.mxu1 %v3168_v55  ;;  %v1173_v59 = vpop.xlane.xlu0 %1172 }
 0x628   :  { %3171 = vmatpush3.bf16.msra.mxu1 %v3168_v55  ;;  %v1179_v21 = vsub.f32 %v1163_v42, %v1173_v59 }
 0x629   :  { %v3176_v60 = vpack.c.bf16 %v3310_v57, %v3309_v58 }
 0x62a   :  { %v3313_v62 = vpop.permute.xlu1 %3312  ;;  %v1185_v22 = vmul.f32 1.442695, %v1179_v21 }
 0x62b   :  { %3178 = vmatprep.subr.msk.bf16.mxu1 %vm3766_vm6, %v3176_v60  ;;  %v1176_v61 = vpop.xlane.xlu0 %1175  ;;  %v3315_v4 = vunpack.i.h.bf16 %v3313_v62  ;;  %v3314_v11 = vunpack.i.l.bf16 %v3313_v62 }
 0x62c   :  { %v1180_v63 = vsub.f32 %v1164_v43, %v1176_v61 }
 0x62d   :  { %v3365_v0 = vpop.eup %3364  ;;  %v3182_v18 = vpack.c.bf16 %v3315_v4, %v3314_v11 }
 0x62e   :  { %v3367_v1 = vpop.eup %3366  ;;  %v1187_v2 = vmul.f32 1.442695, %v1180_v63  ;;  %v1192_v3 = vsel %vm756_vm7, %v3365_v0, 0.0 }
 0x62f   :  { %1193 = vadd.xlane.f32.xlu0 %v1192_v3  ;;  %v3303_v6 = vpop.permute.xlu0 %3302  ;;  %v1189_v8 = vsel %vm756_vm7, %v3367_v1, 0.0 }
 0x630   :  { %3368 = vpow2.f32 %v1187_v2  ;;  %v3305_v14 = vunpack.i.h.bf16 %v3303_v6  ;;  %v3304_v15 = vunpack.i.l.bf16 %v3303_v6  ;;  %1190 = vadd.xlane.f32.xlu1 %v1189_v8 }
 0x631   :  { %3370 = vpow2.f32 %v1185_v22 }
 0x632   :  { %v3172_v16 = vpack.c.bf16 %v3305_v14, %v3304_v15 }
 0x634   :  { %3173 = vmatprep.subr.bf16.mxu0 %v3172_v16 }
 0x635   :  { %3175 = vmatpush3.bf16.msra.mxu0 %v3172_v16 }
 0x636   :  { %3184 = vmatprep.subr.msk.bf16.mxu0 %vm3766_vm6, %v3182_v18 }
 0x63a   :  { %v3369_v19 = vpop.eup %3368 }
 0x63b   :  { %v1198_v20 = vsel %vm756_vm7, %v3369_v19, 0.0  ;;  %v3371_v23 = vpop.eup %3370 }
 0x63c   :  { %1199 = vadd.xlane.f32.xlu0 %v1198_v20  ;;  %v1195_v24 = vsel %vm756_vm7, %v3371_v23, 0.0 }
 0x641   :  { %1406 = vrot.lane.b32.xlu1 %v3744_v5, %s3563_s24 }
 0x652   :  { %1404 = vrot.lane.b32.xlu0 %v3746_v7, %s3563_s24 }
 0x656   :  { %1495 = vrot.lane.b32.xlu0 %v3756_v12, %s3563_s24 }
 0x665   :  { %1196 = vadd.xlane.f32.xlu1 %v1195_v24 }
 0x676   :  { %1497 = vrot.lane.b32.xlu1 %v3754_v10, %s3563_s24 }
 0x6bc   :  { %v1194_v25 = vpop.xlane.xlu0 %1193 }
 0x6bd   :  { %3372 = vrcp.f32 %v1194_v25  ;;  %v1191_v26 = vpop.xlane.xlu1 %1190 }
 0x6be   :  { %3374 = vrcp.f32 %v1191_v26 }
 0x6c1   :  { %v1407_v33 = vpop.permute.xlu1 %1406 }
 0x6c7   :  { %v3373_v27 = vpop.eup %3372 }
 0x6c8   :  { %v3375_v28 = vpop.eup %3374  ;;  %v1206_v31 = vmul.f32 %v3373_v27, %v3365_v0 }
 0x6c9   :  { %v1200_v29 = vpop.xlane.xlu0 %1199  ;;  %v1205_v30 = vmul.f32 %v3375_v28, %v3367_v1 }
 0x6ca   :  { %3376 = vrcp.f32 %v1200_v29 }
 0x6cb   :  { %3000 = vmatprep.mubr.msk.f32.mxu1 %vm756_vm7, %v1205_v30 }
 0x6cc   :  { %3001 = vmatmul.mubr.msk.f32.vlgmr.msra.gmra.mrb[12].mxu1 %vm756_vm7, %v1206_v31 }
 0x6cd   :  { %3181 = vmatpush3.bf16.xpose.msk.msra.mxu1 %vm3766_vm6, %v3176_v60  ;;  %v1405_v32 = vpop.permute.xlu0 %1404 }
 0x6ce   :  { %3014 = vmatprep.mubr.msk.f32.mxu1 %vm579_vm5, %v1405_v32 }
 0x6d1   :  { %v1496_v39 = vpop.permute.xlu0 %1495 }
 0x6d4   :  { %3015 = vmatmul.mubr.msk.f32.vlgmr.msra.gmra.mrb[14].mxu1 %vm579_vm5, %v1407_v33  ;;  %v3377_v35 = vpop.eup %3376 }
 0x6d5   :  { %v1208_v38 = vmul.f32 %v3377_v35, %v3369_v19 }
 0x6f2   :  { %v1197_v34 = vpop.xlane.xlu1 %1196 }
 0x6f3   :  { %3378 = vrcp.f32 %v1197_v34 }
 0x6f6   :  { %v1498_v40 = vpop.permute.xlu1 %1497 }
 0x6fd   :  { %v3379_v36 = vpop.eup %3378 }
 0x6fe   :  { %v1207_v37 = vmul.f32 %v3379_v36, %v3371_v23 }
 0x700   :  { %3007 = vmatprep.mubr.msk.f32.mxu0 %vm756_vm7, %v1207_v37 }
 0x701   :  { %3008 = vmatmul.mubr.msk.f32.vlgmr.msra.gmra.mrb[8].mxu0 %vm756_vm7, %v1208_v38 }
 0x702   :  { %3187 = vmatpush3.bf16.xpose.msk.msra.mxu0 %vm3766_vm6, %v3182_v18  ;;  %3021 = vmatprep.mubr.msk.f32.mxu0 %vm579_vm5, %v1496_v39 }
 0x709   :  { %3022 = vmatmul.mubr.msk.f32.vlgmr.msra.gmra.mrb[10].mxu0 %vm579_vm5, %v1498_v40 }
 0x79f   :  { %v3856_v41 = vpop.f32.mrb[12].mxu1 }
 0x7a0   :  { %v3858_v42 = vpop.f32.mrb[13].mxu1 }
 0x7a7   :  { %v3016_v43 = vpop.f32.mrb[14].mxu1 }
 0x7a8   :  { %v1587_v44 = vmul.f32 0.35355338, %v3016_v43  ;;  %v1486_v45 = vpop.f32.mrb[15].mxu1 }
 0x7a9   :  { %v1586_v46 = vmul.f32 0.35355338, %v1486_v45 }
 0x7aa   :  { %v1593_v47 = vsel %vm756_vm7, %v1587_v44, -inf }
 0x7ab   :  { %1594 = vmax.xlane.f32.xlu1 %v1593_v47  ;;  %v1590_v48 = vsel %vm756_vm7, %v1586_v46, -inf }
 0x7ac   :  { %1591 = vmax.xlane.f32.xlu0 %v1590_v48 }
 0x7bc   :  { %3317 = vrot.lane.b32.xlu1 %v3752_v9, %s3564_s4 }
 0x7c0   :  { %3327 = vrot.lane.b32.xlu1 %v3752_v9, %s3565_s21 }
 0x7c4   :  { %3332 = vrot.lane.b32.xlu1 %v3761_v13, %s3565_s21 }
 0x7d4   :  { %v3865_v49 = vpop.f32.mrb[8].mxu0 }
 0x7d5   :  { %v3867_v50 = vpop.f32.mrb[9].mxu0 }
 0x7dc   :  { %v3023_v51 = vpop.f32.mrb[10].mxu0 }
 0x7dd   :  { %v1577_v52 = vpop.f32.mrb[11].mxu0  ;;  %v1589_v54 = vmul.f32 0.35355338, %v3023_v51 }
 0x7de   :  { %v1588_v53 = vmul.f32 0.35355338, %v1577_v52 }
 0x7df   :  { %v1599_v56 = vsel %vm756_vm7, %v1589_v54, -inf }
 0x7e0   :  { %v1596_v55 = vsel %vm756_vm7, %v1588_v53, -inf }
 0x7e1   :  { %1597 = vmax.xlane.f32.xlu0 %v1596_v55 }
 0x7e5   :  { %1600 = vmax.xlane.f32.xlu0 %v1599_v56 }
 0x7fb   :  { %3322 = vrot.lane.b32.xlu0 %v3761_v13, %s3564_s4 }
 0x838   :  { %v1595_v57 = vpop.xlane.xlu1 %1594 }
 0x839   :  { %v1603_v58 = vsub.f32 %v1587_v44, %v1595_v57  ;;  %v1592_v59 = vpop.xlane.xlu0 %1591 }
 0x83a   :  { %v1602_v60 = vsub.f32 %v1586_v46, %v1592_v59 }
 0x83b   :  { %v1608_v61 = vmul.f32 1.442695, %v1603_v58 }
 0x83c   :  { %v1606_v62 = vmul.f32 1.442695, %v1602_v60  ;;  %v3318_v63 = vpop.permute.xlu1 %3317 }
 0x83d   :  { %3380 = vpow2.f32 %v1608_v61  ;;  %v3320_v0 = vunpack.i.h.bf16 %v3318_v63  ;;  %v3319_v1 = vunpack.i.l.bf16 %v3318_v63 }
 0x83e   :  { %3382 = vpow2.f32 %v1606_v62 }
 0x83f   :  { %v3188_v2 = vpack.c.bf16 %v3320_v0, %v3319_v1 }
 0x840   :  { %v3328_v3 = vpop.permute.xlu1 %3327 }
 0x841   :  { %v3330_v4 = vunpack.i.h.bf16 %v3328_v3  ;;  %v3329_v6 = vunpack.i.l.bf16 %v3328_v3  ;;  %3189 = vmatprep.subr.bf16.mxu1 %v3188_v2 }
 0x842   :  { %3191 = vmatpush3.bf16.msra.mxu1 %v3188_v2 }
 0x843   :  { %v3196_v8 = vpack.c.bf16 %v3330_v4, %v3329_v6 }
 0x844   :  { %v3333_v22 = vpop.permute.xlu1 %3332 }
 0x845   :  { %3198 = vmatprep.subr.msk.bf16.mxu1 %vm3766_vm6, %v3196_v8  ;;  %v3335_v25 = vunpack.i.h.bf16 %v3333_v22  ;;  %v3334_v27 = vunpack.i.l.bf16 %v3333_v22 }
 0x847   :  { %v3381_v11 = vpop.eup %3380  ;;  %v3202_v31 = vpack.c.bf16 %v3335_v25, %v3334_v27 }
 0x848   :  { %v3383_v14 = vpop.eup %3382  ;;  %v1617_v15 = vsel %vm756_vm7, %v3381_v11, 0.0 }
 0x849   :  { %1618 = vadd.xlane.f32.xlu0 %v1617_v15  ;;  %v1614_v16 = vsel %vm756_vm7, %v3383_v14, 0.0 }
 0x84a   :  { %1615 = vadd.xlane.f32.xlu1 %v1614_v16 }
 0x85b   :  { %1831 = vrot.lane.b32.xlu1 %v3744_v5, %s3566_s25 }
 0x86e   :  { %v1598_v18 = vpop.xlane.xlu0 %1597 }
 0x86f   :  { %v1604_v19 = vsub.f32 %v1588_v53, %v1598_v18 }
 0x871   :  { %v1610_v20 = vmul.f32 1.442695, %v1604_v19 }
 0x872   :  { %v1601_v21 = vpop.xlane.xlu0 %1600 }
 0x873   :  { %3384 = vpow2.f32 %v1610_v20  ;;  %v1605_v23 = vsub.f32 %v1589_v54, %v1601_v21 }
 0x875   :  { %v1612_v24 = vmul.f32 1.442695, %v1605_v23 }
 0x876   :  { %v3323_v26 = vpop.permute.xlu0 %3322 }
 0x877   :  { %3386 = vpow2.f32 %v1612_v24  ;;  %v3325_v28 = vunpack.i.h.bf16 %v3323_v26  ;;  %v3324_v29 = vunpack.i.l.bf16 %v3323_v26 }
 0x879   :  { %v3192_v30 = vpack.c.bf16 %v3325_v28, %v3324_v29 }
 0x87b   :  { %3193 = vmatprep.subr.bf16.mxu0 %v3192_v30 }
 0x87c   :  { %3195 = vmatpush3.bf16.msra.mxu0 %v3192_v30 }
 0x87d   :  { %v3385_v32 = vpop.eup %3384  ;;  %3204 = vmatprep.subr.msk.bf16.mxu0 %vm3766_vm6, %v3202_v31 }
 0x87e   :  { %v1620_v5 = vsel %vm756_vm7, %v3385_v32, 0.0 }
 0x87f   :  { %1621 = vadd.xlane.f32.xlu1 %v1620_v5 }
 0x881   :  { %v3387_v33 = vpop.eup %3386 }
 0x882   :  { %v1623_v34 = vsel %vm756_vm7, %v3387_v33, 0.0 }
 0x883   :  { %1624 = vadd.xlane.f32.xlu0 %v1623_v34 }
 0x890   :  { %1922 = vrot.lane.b32.xlu1 %v3754_v10, %s3566_s25 }
 0x899   :  { %1829 = vrot.lane.b32.xlu0 %v3746_v7, %s3566_s25 }
 0x89d   :  { %1920 = vrot.lane.b32.xlu0 %v3756_v12, %s3566_s25 }
 0x8d6   :  { %v1619_v35 = vpop.xlane.xlu0 %1618 }
 0x8d7   :  { %3388 = vrcp.f32 %v1619_v35  ;;  %v1616_v36 = vpop.xlane.xlu1 %1615 }
 0x8d8   :  { %3390 = vrcp.f32 %v1616_v36 }
 0x8db   :  { %v1832_v10 = vpop.permute.xlu1 %1831 }
 0x8e1   :  { %v3389_v37 = vpop.eup %3388 }
 0x8e2   :  { %v3391_v38 = vpop.eup %3390  ;;  %v1631_v40 = vmul.f32 %v3389_v37, %v3381_v11 }
 0x8e3   :  { %v1630_v39 = vmul.f32 %v3391_v38, %v3383_v14 }
 0x8e5   :  { %3028 = vmatprep.mubr.msk.f32.mxu1 %vm756_vm7, %v1630_v39 }
 0x8e6   :  { %3029 = vmatmul.mubr.msk.f32.vlgmr.msra.gmra.mrb[16].mxu1 %vm756_vm7, %v1631_v40 }
 0x8e7   :  { %3201 = vmatpush3.bf16.xpose.msk.msra.mxu1 %vm3766_vm6, %v3196_v8 }
 0x90c   :  { %v1622_v43 = vpop.xlane.xlu1 %1621 }
 0x90d   :  { %3392 = vrcp.f32 %v1622_v43 }
 0x910   :  { %v1625_v7 = vpop.xlane.xlu0 %1624  ;;  %v1923_v51 = vpop.permute.xlu1 %1922 }
 0x911   :  { %3394 = vrcp.f32 %v1625_v7 }
 0x914   :  { %v1830_v12 = vpop.permute.xlu0 %1829 }
 0x915   :  { %3042 = vmatprep.mubr.msk.f32.mxu1 %vm579_vm5, %v1830_v12 }
 0x916   :  { %3043 = vmatmul.mubr.msk.f32.vlgmr.msra.gmra.mrb[18].mxu1 %vm579_vm5, %v1832_v10 }
 0x917   :  { %v3393_v44 = vpop.eup %3392 }
 0x918   :  { %v1632_v45 = vmul.f32 %v3393_v44, %v3385_v32  ;;  %v1921_v48 = vpop.permute.xlu0 %1920 }
 0x91a   :  { %3035 = vmatprep.mubr.msk.f32.mxu0 %vm756_vm7, %v1632_v45 }
 0x91b   :  { %v3395_v46 = vpop.eup %3394 }
 0x91c   :  { %v1633_v47 = vmul.f32 %v3395_v46, %v3387_v33 }
 0x91e   :  { %3036 = vmatmul.mubr.msk.f32.vlgmr.msra.gmra.mrb[12].mxu0 %vm756_vm7, %v1633_v47 }
 0x91f   :  { %3207 = vmatpush3.bf16.xpose.msk.msra.mxu0 %vm3766_vm6, %v3202_v31  ;;  %3049 = vmatprep.mubr.msk.f32.mxu0 %vm579_vm5, %v1921_v48 }
 0x926   :  { %3050 = vmatmul.mubr.msk.f32.vlgmr.msra.gmra.mrb[14].mxu0 %vm579_vm5, %v1923_v51 }
 0x9b9   :  { %v3030_v52 = vpop.f32.mrb[16].mxu1 }
 0x9ba   :  { %v1712_v53 = vpop.f32.mrb[17].mxu1 }
 0x9e9   :  { %v3044_v54 = vpop.f32.mrb[18].mxu1 }
 0x9ea   :  { %v2012_v55 = vmul.f32 0.35355338, %v3044_v54  ;;  %v1911_v56 = vpop.f32.mrb[19].mxu1 }
 0x9eb   :  { %v2011_v57 = vmul.f32 0.35355338, %v1911_v56  ;;  %v2261_v56 = vld [vmem:[#allocation9 + $0x18] sm:$0xff] }
 0x9ec   :  { %v2018_v58 = vsel %vm756_vm7, %v2012_v55, -inf }
 0x9ed   :  { %2019 = vmax.xlane.f32.xlu1 %v2018_v58  ;;  %v2015_v59 = vsel %vm756_vm7, %v2011_v57, -inf }
 0x9ee   :  { %2016 = vmax.xlane.f32.xlu0 %v2015_v59 }
 0x9f1   :  { %v3037_v60 = vpop.f32.mrb[12].mxu0 }
 0x9f2   :  { %v1799_v17 = vpop.f32.mrb[13].mxu0 }
 0x9f9   :  { %v3051_v61 = vpop.f32.mrb[14].mxu0 }
 0x9fa   :  { %v2002_v62 = vpop.f32.mrb[15].mxu0  ;;  %v2014_v0 = vmul.f32 0.35355338, %v3051_v61 }
 0x9fb   :  { %v2013_v63 = vmul.f32 0.35355338, %v2002_v62 }
 0x9fc   :  { %v2024_v2 = vsel %vm756_vm7, %v2014_v0, -inf }
 0x9fd   :  { %v2021_v1 = vsel %vm756_vm7, %v2013_v63, -inf }
 0x9fe   :  { %2022 = vmax.xlane.f32.xlu0 %v2021_v1 }
 0xa02   :  { %2025 = vmax.xlane.f32.xlu0 %v2024_v2 }
 0xa7a   :  { %v2020_v3 = vpop.xlane.xlu1 %2019 }
 0xa7b   :  { %v2028_v4 = vsub.f32 %v2012_v55, %v2020_v3  ;;  %v2017_v6 = vpop.xlane.xlu0 %2016  ;;  %v2260_v55 = vld [vmem:[#allocation9 + $0x10] sm:$0xff] }
 0xa7c   :  { %v2027_v8 = vsub.f32 %v2011_v57, %v2017_v6  ;;  %v3220_v57 = vpack.c.bf16 %v2261_v56, %v2260_v55 }
 0xa7d   :  { %v2033_v11 = vmul.f32 1.442695, %v2028_v4 }
 0xa7e   :  { %v2031_v14 = vmul.f32 1.442695, %v2027_v8 }
 0xa7f   :  { %3396 = vpow2.f32 %v2033_v11 }
 0xa80   :  { %3398 = vpow2.f32 %v2031_v14  ;;  %v2368_v14 = vld [vmem:[%s4009_s7 + $0x10] sm:$0xff] }
 0xa89   :  { %v3397_v15 = vpop.eup %3396 }
 0xa8a   :  { %v3399_v16 = vpop.eup %3398  ;;  %v2042_v18 = vsel %vm756_vm7, %v3397_v15, 0.0 }
 0xa8b   :  { %v2023_v19 = vpop.xlane.xlu0 %2022  ;;  %2043 = vadd.xlane.f32.xlu0 %v2042_v18  ;;  %v2039_v20 = vsel %vm756_vm7, %v3399_v16, 0.0  ;;  %v2766_v18 = vld [vmem:[%s4008_s6] ss:$0 sm:$0xff] }
 0xa8c   :  { %v2029_v21 = vsub.f32 %v2013_v63, %v2023_v19  ;;  %2040 = vadd.xlane.f32.xlu1 %v2039_v20 }
 0xa8e   :  { %v2035_v22 = vmul.f32 1.442695, %v2029_v21 }
 0xa8f   :  { %v2026_v23 = vpop.xlane.xlu0 %2025 }
 0xa90   :  { %3400 = vpow2.f32 %v2035_v22  ;;  %v2030_v24 = vsub.f32 %v2014_v0, %v2026_v23 }
 0xa92   :  { %v2037_v25 = vmul.f32 1.442695, %v2030_v24 }
 0xa94   :  { %3402 = vpow2.f32 %v2037_v25 }
 0xa9a   :  { %v3401_v26 = vpop.eup %3400 }
 0xa9b   :  { %v2045_v27 = vsel %vm756_vm7, %v3401_v26, 0.0 }
 0xa9c   :  { %2046 = vadd.xlane.f32.xlu1 %v2045_v27  ;;  %v2478_v27 = vld [vmem:[%s4011_s9] sm:$0xff] }
 0xa9e   :  { %v3403_v28 = vpop.eup %3402 }
 0xa9f   :  { %v2048_v29 = vsel %vm756_vm7, %v3403_v28, 0.0 }
 0xaa0   :  { %2049 = vadd.xlane.f32.xlu0 %v2048_v29 }
 0xaad   :  { %3337 = vrot.lane.b32.xlu1 %v3752_v9, %s3567_s26 }
 0xab1   :  { %1387 = vrot.lane.b32.xlu1 %v3858_v42, %s3553_s14 }
 0xab5   :  { %1389 = vrot.lane.b32.xlu1 %v3856_v41, %s3553_s14 }
 0xab6   :  { %3342 = vrot.lane.b32.xlu0 %v3761_v13, %s3567_s26 }
 0xab9   :  { %1814 = vrot.lane.b32.xlu1 %v3030_v52, %s3568_s5  ;;  %v2258_v52 = vld [vmem:[#allocation9] sm:$0xff] }
 0xaba   :  { %1812 = vrot.lane.b32.xlu0 %v1712_v53, %s3568_s5  ;;  %v2259_v53 = vld [vmem:[#allocation9 + $0x8] sm:$0xff] }
 0xabb   :  { %v3216_v54 = vpack.c.bf16 %v2259_v53, %v2258_v52 }
 0xabd   :  { %1393 = vrot.lane.b32.xlu1 %v3865_v49, %s3553_s14 }
 0xabe   :  { %1391 = vrot.lane.b32.xlu0 %v3867_v50, %s3553_s14  ;;  %s3569_s14 = smov 24  }
 0xac1   :  { %1818 = vrot.lane.b32.xlu1 %v3037_v60, %s3568_s5  ;;  %v2366_v60 = vld [vmem:[%s4009_s7] sm:$0xff] }
 0xac2   :  { %1816 = vrot.lane.b32.xlu0 %v1799_v17, %s3568_s5  ;;  %v2367_v17 = vld [vmem:[%s4009_s7 + $0x8] sm:$0xff] }
 0xac3   :  { %v3224_v61 = vpack.c.bf16 %v2367_v17, %v2366_v60 }
 0xb18   :  { %v2044_v42 = vpop.xlane.xlu0 %2043 }
 0xb19   :  { %v2041_v9 = vpop.xlane.xlu1 %2040 }
 0xb1a   :  { %3404 = vrcp.f32 %v2041_v9  ;;  %v2771_v9 = vld [vmem:[%s4010_s8] ss:$0 sm:$0xff]  ;;  %s3571_s8 = smov [#allocation11]  }
 0xb1b   :  { %3406 = vrcp.f32 %v2044_v42 }
 0xb24   :  { %v3405_v30 = vpop.eup %3404 }
 0xb25   :  { %v2055_v31 = vmul.f32 %v3405_v30, %v3399_v16  ;;  %v3407_v50 = vpop.eup %3406 }
 0xb26   :  { %v2056_v39 = vmul.f32 %v3407_v50, %v3397_v15  ;;  %v2369_v15 = vld [vmem:[%s4009_s7 + $0x18] sm:$0xff] }
 0xb27   :  { %3056 = vmatprep.mubr.msk.f32.mxu1 %vm756_vm7, %v2055_v31  ;;  %v3228_v16 = vpack.c.bf16 %v2369_v15, %v2368_v14 }
 0xb29   :  { %v2047_v13 = vpop.xlane.xlu1 %2046 }
 0xb2a   :  { %3408 = vrcp.f32 %v2047_v13 }
 0xb2d   :  { %v3338_v41 = vpop.permute.xlu1 %3337  ;;  %v2050_v32 = vpop.xlane.xlu0 %2049 }
 0xb2e   :  { %v3340_v5 = vunpack.i.h.bf16 %v3338_v41  ;;  %v3339_v33 = vunpack.i.l.bf16 %v3338_v41  ;;  %3410 = vrcp.f32 %v2050_v32 }
 0xb30   :  { %v3208_v49 = vpack.c.bf16 %v3340_v5, %v3339_v33 }
 0xb31   :  { %v1388_v34 = vpop.permute.xlu1 %1387  ;;  %v3343_v35 = vpop.permute.xlu0 %3342 }
 0xb32   :  { %1400 = vst.msk [vmem:[#allocation2] sm:$0xff] %vm1399_vm8, %v1388_v34  ;;  %v3345_v36 = vunpack.i.h.bf16 %v3343_v35  ;;  %v3344_v37 = vunpack.i.l.bf16 %v3343_v35  ;;  %3209 = vmatprep.subr.bf16.mxu1 %v3208_v49 }
 0xb33   :  { %3211 = vmatpush3.bf16.msra.mxu1 %v3208_v49 }
 0xb34   :  { %v3409_v38 = vpop.eup %3408  ;;  %v3212_v40 = vpack.c.bf16 %v3345_v36, %v3344_v37  ;;  %3217 = vmatprep.subr.bf16.mxu1 %v3216_v54  ;;  %v3570_v36 = vmov 0  }
 0xb35   :  { %v1390_v10 = vpop.permute.xlu1 %1389  ;;  %v1813_v43 = vpop.permute.xlu0 %1812  ;;  %v2057_v7 = vmul.f32 %v3409_v38, %v3401_v26  ;;  %3347 = vset.pattern.permute.xlu1 %v3570_v36  ;;  %3346 = vset.pattern.permute.xlu0 %v3570_v36 }
 0xb36   :  { %1401 = vst.msk [vmem:[#allocation2 + $0x8] sm:$0xff] %vm1399_vm8, %v1390_v10  ;;  %3057 = vmatmul.mubr.msk.f32.vlgmr.msra.gmra.mrb[20].mxu1 %vm756_vm7, %v2056_v39  ;;  %3213 = vmatprep.subr.bf16.mxu0 %v3212_v40 }
 0xb37   :  { %1825 = vst.msk [vmem:[#allocation2] sm:$0xff] %vm1824_vm9, %v1813_v43  ;;  %3215 = vmatpush3.bf16.msra.mxu0 %v3212_v40  ;;  %3063 = vmatprep.mubr.msk.f32.mxu0 %vm756_vm7, %v2057_v7 }
 0xb38   :  { %v3411_v12 = vpop.eup %3410  ;;  %3219 = vmatpush3.bf16.msra.mxu1 %v3216_v54  ;;  %3225 = vmatprep.subr.bf16.mxu0 %v3224_v61 }
 0xb39   :  { %v2058_v44 = vmul.f32 %v3411_v12, %v3403_v28  ;;  %v1815_v45 = vpop.permute.xlu1 %1814  ;;  %v1392_v46 = vpop.permute.xlu0 %1391  ;;  %3221 = vmatprep.subr.bf16.mxu1 %v3220_v57  ;;  %v2479_v28 = vld [vmem:[%s4011_s9 + $0x8] sm:$0xff]  ;;  %s2687_s9 = sshll.u32 %s3571_s8, 4  ;;  %s2688_s9 = int_to_ptr.vmem [resolvable:$true] %s2687_s9 }
 0xb3a   :  { %1826 = vst.msk [vmem:[#allocation2 + $0x8] sm:$0xff] %vm1824_vm9, %v1815_v45  ;;  %v3232_v29 = vpack.c.bf16 %v2479_v28, %v2478_v27  ;;  %s3520_s17 = scalar_lea.vmem %s2688_s9, 32  ;;  %p3525_p5 = scmp.lt.s32.totalorder %s2688_s9, %s2688_s9 }
 0xb3b   :  { %1402 = vst.msk [vmem:[#allocation2 + $0x10] sm:$0xff] %vm1399_vm8, %v1392_v46  ;;  %3064 = vmatmul.mubr.msk.f32.vlgmr.msra.gmra.mrb[16].mxu0 %vm756_vm7, %v2058_v44  ;;  %p3521_p4 = scmp.ne.s32.totalorder %s2688_s9, %s3520_s17  ;;  %p3526_p6 = scmp.lt.s32.totalorder %s3520_s17, %s3520_s17 }
 0xb3c   :  { %3223 = vmatpush3.bf16.msra.mxu1 %v3220_v57  ;;  %3227 = vmatpush3.bf16.msra.mxu0 %v3224_v61 }
 0xb3d   :  { %v1394_v47 = vpop.permute.xlu1 %1393  ;;  %v1817_v48 = vpop.permute.xlu0 %1816  ;;  %3229 = vmatprep.subr.bf16.mxu0 %v3228_v16  ;;  %3233 = vmatprep.subr.bf16.mxu1 %v3232_v29  ;;  %p3527_p7 = por %p3526_p6, %p3525_p5 }
 0xb3e   :  { %1403 = vst.msk [vmem:[#allocation2 + $0x18] sm:$0xff] %vm1399_vm8, %v1394_v47 }
 0xb3f   :  { %1827 = vst.msk [vmem:[#allocation2 + $0x10] sm:$0xff] %vm1824_vm9, %v1817_v48  ;;  %p3528_p8 = pnand %p3527_p7, %p3521_p4 }
 0xb40   :  { %3231 = vmatpush3.bf16.msra.mxu0 %v3228_v16 }
 0xb41   :  { %v1819_v51 = vpop.permute.xlu1 %1818 }
 0xb42   :  { %1828 = vst.msk [vmem:[#allocation2 + $0x18] sm:$0xff] %vm1824_vm9, %v1819_v51 }
 0xc09   :  { %v3058_v58 = vpop.f32.mrb[20].mxu1 }
 0xc0a   :  { %2239 = vrot.lane.b32.xlu1 %v3058_v58, %s3569_s14  ;;  %v2137_v59 = vpop.f32.mrb[21].mxu1 }
 0xc0b   :  { %2237 = vrot.lane.b32.xlu0 %v2137_v59, %s3569_s14 }
 0xc0e   :  { %v3065_v62 = vpop.f32.mrb[16].mxu0 }
 0xc0f   :  { %2243 = vrot.lane.b32.xlu1 %v3065_v62, %s3569_s14  ;;  %v2224_v63 = vpop.f32.mrb[17].mxu0 }
 0xc10   :  { %2241 = vrot.lane.b32.xlu0 %v2224_v63, %s3569_s14 }
 0xc7c   :  { %v2240_v0 = vpop.permute.xlu1 %2239 }
 0xc7d   :  { %2251 = vst.msk [vmem:[#allocation2 + $0x8] sm:$0xff] %vm2249_vm10, %v2240_v0  ;;  %v2238_v1 = vpop.permute.xlu0 %2237 }
 0xc7e   :  { %2250 = vst.msk [vmem:[#allocation2] sm:$0xff] %vm2249_vm10, %v2238_v1 }
 0xc81   :  { %v2244_v2 = vpop.permute.xlu1 %2243 }
 0xc82   :  { %2253 = vst.msk [vmem:[#allocation2 + $0x18] sm:$0xff] %vm2249_vm10, %v2244_v2  ;;  %v2242_v3 = vpop.permute.xlu0 %2241 }
 0xc83   :  { %2252 = vst.msk [vmem:[#allocation2 + $0x10] sm:$0xff] %vm2249_vm10, %v2242_v3 }
 0xc84   :  { %v2255_v6 = vld [vmem:[#allocation2 + $0x8] sm:$0xff] }
 0xc85   :  { %v2254_v4 = vld [vmem:[#allocation2] sm:$0xff] }
 0xc86   :  { %3074 = vmatprep.mubr.msk.f32.mxu1 %vm130_vm0, %v2254_v4 }
 0xc87   :  { %3075 = vmatmul.mubr.msk.f32.vlgmr.msra.gmra.mrb[22].mxu1 %vm130_vm0, %v2255_v6 }
 0xc88   :  { %3235 = vmatpush3.bf16.msra.mxu1 %v3232_v29 }
 0xc89   :  { %v2257_v11 = vld [vmem:[#allocation2 + $0x18] sm:$0xff] }
 0xc8a   :  { %v2256_v8 = vld [vmem:[#allocation2 + $0x10] sm:$0xff] }
 0xc8b   :  { %3077 = vmatprep.mubr.msk.f32.mxu1 %vm130_vm0, %v2256_v8 }
 0xc8c   :  { %3078 = vmatmul.mubr.msk.f32.gmra.mrb[24].mxu1 %vm130_vm0, %v2257_v11 }
 0xd5a   :  { %v3076_v19 = vpop.f32.mrb[22].mxu1 }
 0xd5b   :  { %v2347_v20 = vpop.f32.mrb[23].mxu1  ;;  %v3947_v22 = vadd.f32 %v3076_v19, %v2766_v18 }
 0xd5c   :  { %v3945_v21 = vadd.f32 %v2766_v18, %v2347_v20 }
 0xd5e   :  { %3088 = vmatprep.mubr.msk.f32.mxu0 %vm130_vm0, %v3945_v21 }
 0xd5f   :  { %v3079_v23 = vpop.f32.mrb[24].mxu1  ;;  %3089 = vmatmul.mubr.msk.f32.vlgmr.msra.gmra.mrb[18].mxu0 %vm130_vm0, %v3947_v22 }
 0xd60   :  { %v2357_v24 = vpop.f32.mrb[25].mxu1  ;;  %v3955_v26 = vadd.f32 %v3079_v23, %v2766_v18 }
 0xd61   :  { %v3953_v25 = vadd.f32 %v2766_v18, %v2357_v24 }
 0xd63   :  { %3091 = vmatprep.mubr.msk.f32.mxu0 %vm130_vm0, %v3953_v25 }
 0xd64   :  { %3092 = vmatmul.mubr.msk.f32.gmra.mrb[20].mxu0 %vm130_vm0, %v3955_v26 }
 0xe32   :  { %v3090_v30 = vpop.f32.mrb[18].mxu0 }
 0xe33   :  { %v2461_v42 = vadd.f32 %v3090_v30, %v2771_v9  ;;  %v2455_v31 = vpop.f32.mrb[19].mxu0 }
 0xe34   :  { %v2456_v13 = vadd.f32 %v2771_v9, %v2455_v31 }
 0xe36   :  { %3412 = vtanh.f32 %v2456_v13 }
 0xe37   :  { %3414 = vtanh.f32 %v2461_v42  ;;  %v3093_v41 = vpop.f32.mrb[20].mxu0 }
 0xe38   :  { %v2471_v32 = vadd.f32 %v3093_v41, %v2771_v9  ;;  %v2465_v5 = vpop.f32.mrb[21].mxu0 }
 0xe39   :  { %v2466_v33 = vadd.f32 %v2771_v9, %v2465_v5 }
 0xe3b   :  { %3416 = vtanh.f32 %v2466_v33 }
 0xe3c   :  { %3418 = vtanh.f32 %v2471_v32 }
 0xe40   :  { %v3413_v49 = vpop.eup %3412 }
 0xe41   :  { %v3415_v50 = vpop.eup %3414  ;;  %3098 = vmatprep.mubr.msk.f32.mxu1 %vm756_vm7, %v3413_v49 }
 0xe42   :  { %3099 = vmatmul.mubr.msk.f32.vlgmr.msra.gmra.mrb[26].mxu1 %vm756_vm7, %v3415_v50 }
 0xe45   :  { %v3417_v34 = vpop.eup %3416 }
 0xe46   :  { %v3419_v35 = vpop.eup %3418  ;;  %3101 = vmatprep.mubr.msk.f32.mxu1 %vm756_vm7, %v3417_v34 }
 0xe47   :  { %3102 = vmatmul.mubr.msk.f32.gmra.mrb[28].mxu1 %vm756_vm7, %v3419_v35 }
 0xf15   :  { %v3100_v37 = vpop.f32.mrb[26].mxu1 }
 0xf16   :  { %v2579_v38 = vsel %vm2577_vm11, %v3100_v37, -inf  ;;  %v2558_v39 = vpop.f32.mrb[27].mxu1 }
 0xf17   :  { %v2578_v40 = vsel %vm2577_vm11, %v2558_v39, -inf }
 0xf18   :  { %v2580_v10 = vmax.f32 %v2578_v40, %v2579_v38 }
 0xf1a   :  { %v2581_v43 = vrot.slane %v2580_v10, 4  ;;  %v3103_v7 = vpop.f32.mrb[28].mxu1 }
 0xf1b   :  { %v2588_v12 = vsel %vm2577_vm11, %v3103_v7, -inf  ;;  %v2568_v44 = vpop.f32.mrb[29].mxu1 }
 0xf1c   :  { %v2582_v45 = vmax.f32 %v2580_v10, %v2581_v43  ;;  %v2587_v46 = vsel %vm2577_vm11, %v2568_v44, -inf }
 0xf1d   :  { %v2589_v47 = vmax.f32 %v2587_v46, %v2588_v12 }
 0xf1e   :  { %v2583_v48 = vrot.slane %v2582_v45, 2 }
 0xf1f   :  { %v2590_v51 = vrot.slane %v2589_v47, 4 }
 0xf20   :  { %v2584_v52 = vmax.f32 %v2582_v45, %v2583_v48 }
 0xf21   :  { %v2591_v53 = vmax.f32 %v2589_v47, %v2590_v51 }
 0xf22   :  { %v2585_v54 = vrot.slane %v2584_v52, 1 }
 0xf23   :  { %v2592_v55 = vrot.slane %v2591_v53, 2 }
 0xf24   :  { %v2586_v56 = vmax.f32 %v2584_v52, %v2585_v54 }
 0xf25   :  { %v2593_v57 = vmax.f32 %v2591_v53, %v2592_v55 }
 0xf26   :  { %v2596_v58 = vsub.f32 %v2558_v39, %v2586_v56  ;;  %v2597_v59 = vsub.f32 %v3100_v37, %v2586_v56 }
 0xf27   :  { %v2594_v60 = vrot.slane %v2593_v57, 1 }
 0xf28   :  { %v2600_v17 = vmul.f32 1.442695, %v2596_v58  ;;  %v2602_v61 = vmul.f32 1.442695, %v2597_v59 }
 0xf29   :  { %v2595_v62 = vmax.f32 %v2593_v57, %v2594_v60 }
 0xf2a   :  { %3420 = vpow2.f32 %v2600_v17 }
 0xf2b   :  { %3422 = vpow2.f32 %v2602_v61  ;;  %v2598_v63 = vsub.f32 %v2568_v44, %v2595_v62  ;;  %v2599_v0 = vsub.f32 %v3103_v7, %v2595_v62 }
 0xf2d   :  { %v2604_v1 = vmul.f32 1.442695, %v2598_v63  ;;  %v2606_v2 = vmul.f32 1.442695, %v2599_v0 }
 0xf2f   :  { %3424 = vpow2.f32 %v2604_v1 }
 0xf30   :  { %3426 = vpow2.f32 %v2606_v2 }
 0xf34   :  { %v3421_v3 = vpop.eup %3420 }
 0xf35   :  { %v3423_v4 = vpop.eup %3422  ;;  %v2608_v6 = vsel %vm2577_vm11, %v3421_v3, 0.0 }
 0xf36   :  { %v2609_v8 = vsel %vm2577_vm11, %v3423_v4, 0.0 }
 0xf37   :  { %v2610_v11 = vadd.f32 %v2609_v8, %v2608_v6 }
 0xf39   :  { %v3425_v14 = vpop.eup %3424  ;;  %v2611_v15 = vrot.slane %v2610_v11, 4 }
 0xf3a   :  { %v3427_v16 = vpop.eup %3426  ;;  %v2617_v18 = vsel %vm2577_vm11, %v3425_v14, 0.0 }
 0xf3b   :  { %v2612_v19 = vadd.f32 %v2611_v15, %v2610_v11  ;;  %v2618_v20 = vsel %vm2577_vm11, %v3427_v16, 0.0 }
 0xf3c   :  { %v2619_v23 = vadd.f32 %v2618_v20, %v2617_v18 }
 0xf3d   :  { %v2613_v24 = vrot.slane %v2612_v19, 2 }
 0xf3e   :  { %v2620_v27 = vrot.slane %v2619_v23, 4 }
 0xf3f   :  { %v2614_v28 = vadd.f32 %v2613_v24, %v2612_v19 }
 0xf40   :  { %v2621_v29 = vadd.f32 %v2620_v27, %v2619_v23 }
 0xf41   :  { %v2615_v9 = vrot.slane %v2614_v28, 1 }
 0xf42   :  { %v2622_v30 = vrot.slane %v2621_v29, 2 }
 0xf43   :  { %v2616_v42 = vadd.f32 %v2615_v9, %v2614_v28 }
 0xf44   :  { %v2623_v31 = vadd.f32 %v2622_v30, %v2621_v29 }
 0xf45   :  { %3428 = vrcp.f32 %v2616_v42 }
 0xf46   :  { %v2624_v13 = vrot.slane %v2623_v31, 1 }
 0xf48   :  { %v2625_v41 = vadd.f32 %v2624_v13, %v2623_v31 }
 0xf4a   :  { %3430 = vrcp.f32 %v2625_v41 }
 0xf4f   :  { %v3429_v32 = vpop.eup %3428 }
 0xf50   :  { %v2629_v5 = vmul.f32 %v3429_v32, %v3423_v4  ;;  %v2628_v33 = vmul.f32 %v3429_v32, %v3421_v3 }
 0xf52   :  { %2639 = vperm.xlu1 %3347, %v2629_v5   ;;  %2634 = vperm.xlu0 %3346, %v2628_v33  }
 0xf54   :  { %v3431_v49 = vpop.eup %3430 }
 0xf55   :  { %v2631_v50 = vmul.f32 %v3431_v49, %v3427_v16  ;;  %v2630_v34 = vmul.f32 %v3431_v49, %v3425_v14 }
 0xf57   :  { %2649 = vperm.xlu0 %3346, %v2631_v50   ;;  %2644 = vperm.xlu1 %3347, %v2630_v34  }
 0xfd1   :  { %v2640_v35 = vpop.permute.xlu1 %2639  ;;  %v2635_v36 = vpop.permute.xlu0 %2634 }
 0xfd2   :  { %v2653_v37 = vmul.f32 %v2640_v35, %v3947_v22  ;;  %v2652_v38 = vmul.f32 %v2635_v36, %v3945_v21 }
 0xfd4   :  { %v2657_v39 = vsel %vm130_vm0, %v2653_v37, 0.0  ;;  %v2656_v40 = vsel %vm130_vm0, %v2652_v38, 0.0 }
 0xfd5   :  { %v2658_v10 = vadd.f32 %v2657_v39, %v2656_v40 }
 0xfd6   :  { %v2650_v43 = vpop.permute.xlu0 %2649  ;;  %v2645_v7 = vpop.permute.xlu1 %2644 }
 0xfd7   :  { %v2659_v12 = vrot.slane %v2658_v10, 4  ;;  %v2655_v44 = vmul.f32 %v2650_v43, %v3955_v26  ;;  %v2654_v45 = vmul.f32 %v2645_v7, %v3953_v25 }
 0xfd9   :  { %v2660_v46 = vadd.f32 %v2659_v12, %v2658_v10  ;;  %v2666_v47 = vsel %vm130_vm0, %v2655_v44, 0.0  ;;  %v2665_v48 = vsel %vm130_vm0, %v2654_v45, 0.0 }
 0xfda   :  { %v2667_v22 = vadd.f32 %v2666_v47, %v2665_v48 }
 0xfdb   :  { %v2661_v51 = vrot.slane %v2660_v46, 2 }
 0xfdc   :  { %v2668_v21 = vrot.slane %v2667_v22, 4 }
 0xfdd   :  { %v2662_v52 = vadd.f32 %v2661_v51, %v2660_v46 }
 0xfde   :  { %v2669_v53 = vadd.f32 %v2668_v21, %v2667_v22 }
 0xfdf   :  { %v2663_v55 = vrot.slane %v2662_v52, 1 }
 0xfe0   :  { %v2670_v54 = vrot.slane %v2669_v53, 2 }
 0xfe1   :  { %v2664_v26 = vadd.f32 %v2663_v55, %v2662_v52 }
 0xfe2   :  { %v2671_v56 = vadd.f32 %v2670_v54, %v2669_v53 }
 0xfe4   :  { %v2672_v57 = vrot.slane %v2671_v56, 1 }
 0xfe6   :  { %v2673_v58 = vadd.f32 %v2672_v57, %v2671_v56 }
 0xfe8   :  { %v2677_v25 = vsel %vm2676_vm12, %v2673_v58, %v2664_v26 }
 0xfe9   :  { %2680 = vst.msk [vmem:[#allocation11] sm:$0x3] %vm2679_vm13, %v2677_v25 }
 0xfea   :  { %3531 = shalt.err (!%p3528_p8)
}
 0xfeb   :  { %s3532_s20 = scalar_lea.hbm %s4012_s10, 32 }
 0xfec   :  { %p3533_p9 = scmp.ne.s32.totalorder %s4012_s10, %s3532_s20  ;;  %p3536_p10 = scmp.lt.u32.totalorder %s3532_s20, %s4012_s10 }
 0xfee   :  { %p3538_p11 = pnand %p3536_p10, %p3533_p9 }
 0xff0   :  { %3541 = shalt.err (!%p3538_p11)
}
 0xff1   :  { %2690 = dma.vmem_to_hbm [thread:$0]  %s2688_s9, 32, %s4012_s10, [#allocation5]  }
 0xff2   :  { %3548 = dma.done.wait [#allocation5], 32  }
 0xff3   :  { %3549 = vsyncadd [#allocation5], 4294967264 }
 0xff4   :  { %2694 = vsyncpa [#allocation4], 1 }
 0xff5   :  { %2695 = vsyncpa [#allocation7], 1 }
 0xff6   :  { %2696 = vsyncpa [#allocation10], 1 }
 0xff7   :  { %2697 = vsyncpa [#allocation5], 1 }

</bundles_post_ra>
